<compile_context>
chip_gen: v6e
topology: v6e:2x2x1
jax: 0.10.0
libtpu: 0.0.40
codegen_flags: <defaults>
</compile_context>

<pallas_src>
import jax
import jax.numpy as jnp
from jax.experimental import pallas as pl
from jax.experimental.pallas import tpu as pltpu


def _round_up(x, m):
    return (x + m - 1) // m * m


def _make_tgcn_kernel(hp):
    """Kernel factory; `hp` is the lane-padded hidden width (multiple of 128)."""
    two_hp = 2 * hp

    def kernel(a_ref, x_ref, h0_ref, wzrh_ref, uzr_ref, uh_ref,
               bzr_ref, bh_ref, wo_ref, bo_ref,
               y_ref, h_ref):
        t = pl.program_id(0)

        # Initialize the resident hidden-state carry from the provided state.
        @pl.when(t == 0)
        def _init():
            h_ref[...] = h0_ref[...]

        H = h_ref[...]                         # f32 carry, persists across grid steps
        Hb = H.astype(jnp.bfloat16)

        # Shared GCN aggregation A_hat @ X (reused by all three gate convs).
        AX = jnp.dot(a_ref[...], x_ref[0], preferred_element_type=jnp.float32)

        # Fused conv-path pre-activations for the z | r | h gates: (N, 3*Hp).
        conv_pre = jnp.dot(AX.astype(jnp.bfloat16), wzrh_ref[...],
                           preferred_element_type=jnp.float32)

        # Fused H-path contribution to the z | r gates: (N, 2*Hp).
        h_pre_zr = jnp.dot(Hb, uzr_ref[...], preferred_element_type=jnp.float32)

        zr = jax.nn.sigmoid(conv_pre[:, :two_hp] + h_pre_zr + bzr_ref[...])
        Z = zr[:, :hp]
        R = zr[:, hp:]

        HR = (H * R).astype(jnp.bfloat16)
        H_tilde = jnp.tanh(
            conv_pre[:, two_hp:]
            + jnp.dot(HR, uh_ref[...], preferred_element_type=jnp.float32)
            + bh_ref[...])

        H_new = Z * H + (1.0 - Z) * H_tilde
        h_ref[...] = H_new

        # y = Linear(relu(H_new)), lane-dense padded output.
        Y = jnp.maximum(H_new, 0.0).astype(jnp.bfloat16)
        y_ref[0] = (jnp.dot(Y, wo_ref[...], preferred_element_type=jnp.float32)
                    + bo_ref[...])

    return kernel


def stgraph_tgcn_forward(a_hat, x_seq, h0, params):
    """Run T recurrent TGCN steps in one pallas_call.

    a_hat : (N, N)        dense symmetrically-normalised adjacency
    x_seq : (T, N, F_in)  node features per timestep
    h0    : (N, F_hid)    initial hidden state
    Returns (y_seq (T, N, F_in), h_final (N, F_hid)).
    """
    t_steps, n, f_in = x_seq.shape
    f_hid = h0.shape[1]
    fp = _round_up(f_in, 128)      # padded input-feature lanes
    hp = _round_up(f_hid, 128)     # padded hidden lanes
    fo = fp                        # padded output lanes (Linear: hid -> f_in)

    # ---- glue: exact fold / concat / zero-pad / cast of parameters ----------
    wz_f = params["wz"] @ params["lzc"]          # (f_in, f_hid)  conv->gate fold
    wr_f = params["wr"] @ params["lrc"]
    wh_f = params["wh"] @ params["lhc"]
    bz_f = params["bz"] @ params["lzc"] + params["lbz"]
    br_f = params["br"] @ params["lrc"] + params["lbr"]
    bh_f = params["bh"] @ params["lhc"] + params["lbh"]

    def pad(m, rows, cols):
        return jnp.zeros((rows, cols), jnp.float32).at[:m.shape[0], :m.shape[1]].set(m)

    w_zrh = jnp.concatenate(
        [pad(wz_f, fp, hp), pad(wr_f, fp, hp), pad(wh_f, fp, hp)],
        axis=1).astype(jnp.bfloat16)                           # (fp, 3*hp)
    u_zr = jnp.concatenate(
        [pad(params["lzh"], hp, hp), pad(params["lrh"], hp, hp)],
        axis=1).astype(jnp.bfloat16)                           # (hp, 2*hp)
    u_h = pad(params["lhh"], hp, hp).astype(jnp.bfloat16)      # (hp, hp)
    b_zr = jnp.concatenate([pad(bz_f, 1, hp), pad(br_f, 1, hp)], axis=1)  # f32
    b_h = pad(bh_f, 1, hp)                                     # f32
    w_o = pad(params["wo"], hp, fo).astype(jnp.bfloat16)       # (hp, fo)
    b_o = pad(params["bo"], 1, fo)                             # f32

    a_b = a_hat.astype(jnp.bfloat16)
    x_p = (jnp.zeros((t_steps, n, fp), jnp.float32)
           .at[:, :, :f_in].set(x_seq).astype(jnp.bfloat16))
    h0_p = jnp.zeros((n, hp), jnp.float32).at[:, :f_hid].set(h0)

    args = (a_b, x_p, h0_p, w_zrh, u_zr, u_h, b_zr, b_h, w_o, b_o)

    def const(shape):
        return pl.BlockSpec(shape, lambda t, _s=shape: (0,) * len(_s))

    in_specs = [
        const((n, n)),                                   # A_hat   (resident)
        pl.BlockSpec((1, n, fp), lambda t: (t, 0, 0)),   # X_t     (per-step)
        const((n, hp)),                                  # H0      (resident)
        const((fp, 3 * hp)),                             # fused conv weights
        const((hp, 2 * hp)),                             # fused H weights (z|r)
        const((hp, hp)),                                 # H weight (h gate)
        const((1, 2 * hp)),                              # fused gate biases (z|r)
        const((1, hp)),                                  # gate bias (h)
        const((hp, fo)),                                 # output Linear weight
        const((1, fo)),                                  # output Linear bias
    ]
    out_specs = (
        pl.BlockSpec((1, n, fo), lambda t: (t, 0, 0)),   # y_t     (per-step)
        const((n, hp)),                                  # H carry (resident)
    )

    flops_per_step = 2 * n * (n * fp + fp * 3 * hp + hp * 2 * hp + hp * hp + hp * fo)
    cost = pl.CostEstimate(
        flops=t_steps * flops_per_step,
        transcendentals=t_steps * n * 3 * hp,
        bytes_accessed=int(sum(a.size * a.dtype.itemsize for a in args)
                           + t_steps * n * fo * 4 + n * hp * 4),
    )

    y_p, h_p = pl.pallas_call(
        _make_tgcn_kernel(hp),
        grid=(t_steps,),
        in_specs=in_specs,
        out_specs=out_specs,
        out_shape=(jax.ShapeDtypeStruct((t_steps, n, fo), jnp.float32),
                   jax.ShapeDtypeStruct((n, hp), jnp.float32)),
        input_output_aliases={2: 1},   # hidden-state input aliased to H output
        compiler_params=pltpu.CompilerParams(
            dimension_semantics=("arbitrary",)),         # time axis is sequential
        cost_estimate=cost,
    )(*args)

    return y_p[:, :, :f_in], h_p[:, :f_hid]


def _init_params(key, node_features, num_hidden_units):
    """Deterministic synthetic parameters matching the module's shapes."""
    f_in, f_hid = node_features, num_hidden_units
    keys = jax.random.split(key, 16)

    def nrm(k, shape, scale=0.1):
        return (scale * jax.random.normal(k, shape)).astype(jnp.float32)

    p = {}
    # GCNConv(f_in -> f_hid) weights + biases for z, r, h gates.
    p["wz"] = nrm(keys[0], (f_in, f_hid))
    p["wr"] = nrm(keys[1], (f_in, f_hid))
    p["wh"] = nrm(keys[2], (f_in, f_hid))
    p["bz"] = nrm(keys[3], (1, f_hid))
    p["br"] = nrm(keys[4], (1, f_hid))
    p["bh"] = nrm(keys[5], (1, f_hid))
    # linear_{z,r,h}: Linear(2*f_hid -> f_hid), stored transposed and split
    # into the [conv | H] halves of the concatenation.
    p["lzc"] = nrm(keys[6], (f_hid, f_hid))
    p["lzh"] = nrm(keys[7], (f_hid, f_hid))
    p["lbz"] = nrm(keys[8], (1, f_hid))
    p["lrc"] = nrm(keys[9], (f_hid, f_hid))
    p["lrh"] = nrm(keys[10], (f_hid, f_hid))
    p["lbr"] = nrm(keys[11], (1, f_hid))
    p["lhc"] = nrm(keys[12], (f_hid, f_hid))
    p["lhh"] = nrm(keys[13], (f_hid, f_hid))
    p["lbh"] = nrm(keys[14], (1, f_hid))
    # Output Linear(f_hid -> f_in), transposed to x @ W form.
    p["wo"] = nrm(keys[15], (f_hid, f_in))
    p["bo"] = jnp.zeros((1, f_in), jnp.float32)
    return p


def _reference_forward(a_hat, x_seq, h0, p):
    """Pure-JAX f32 reference of the un-fused module math over T steps."""
    def step(h, x):
        ax = a_hat @ x
        cz = ax @ p["wz"] + p["bz"]
        cr = ax @ p["wr"] + p["br"]
        ch = ax @ p["wh"] + p["bh"]
        z = jax.nn.sigmoid(cz @ p["lzc"] + h @ p["lzh"] + p["lbz"])
        r = jax.nn.sigmoid(cr @ p["lrc"] + h @ p["lrh"] + p["lbr"])
        ht = jnp.tanh(ch @ p["lhc"] + (h * r) @ p["lhh"] + p["lbh"])
        h_new = z * h + (1.0 - z) * ht
        y = jnp.maximum(h_new, 0.0) @ p["wo"] + p["bo"]
        return h_new, y

    h_final, ys = jax.lax.scan(step, h0, x_seq)
    return ys, h_final


if __name__ == "__main__":
    # Small, module-consistent shapes.
    N = 128                # number of graph nodes
    NODE_FEATURES = 8      # node_features
    HIDDEN = 32            # num_hidden_units
    T = 8                  # timesteps of the recurrence batched per call

    key = jax.random.PRNGKey(0)
    k_feat, k_hid, k_edge, k_param = jax.random.split(key, 4)

    # Synthetic per-timestep node features and initial hidden state.
    x_seq = jax.random.normal(k_feat, (T, N, NODE_FEATURES), jnp.float32)
    h0 = jax.random.normal(k_hid, (N, HIDDEN), jnp.float32)

    # Synthetic graph `g` + `edge_weight` -> dense normalised adjacency (glue).
    raw_w = jax.random.uniform(k_edge, (N, N), jnp.float32)
    mask = (raw_w > 0.9).astype(jnp.float32)             # sparse-ish random graph
    adj = raw_w * mask
    adj = 0.5 * (adj + adj.T) + jnp.eye(N, dtype=jnp.float32)   # self loops
    deg_inv_sqrt = 1.0 / jnp.sqrt(adj.sum(axis=1))
    a_hat = deg_inv_sqrt[:, None] * adj * deg_inv_sqrt[None, :]

    params = _init_params(k_param, NODE_FEATURES, HIDDEN)

    # Pure-JAX reference (f32, un-fused) for correctness.
    y_ref, h_ref = _reference_forward(a_hat, x_seq, h0, params)

    forward = jax.jit(stgraph_tgcn_forward)
    y, h = forward(a_hat, x_seq, h0, params)
    jax.block_until_ready((y, h))

    assert y.shape == (T, N, NODE_FEATURES) and h.shape == (N, HIDDEN)
    # bf16 MXU operands (f32 accumulation) -> relaxed tolerance vs f32 reference.
    assert jnp.allclose(y, y_ref, atol=5e-2, rtol=5e-2)
    assert jnp.allclose(h, h_ref, atol=5e-2, rtol=5e-2)

    print("KERNEL_OK")
</pallas_src>

<mosaic_0001>
module attributes {stable_mosaic.version = 11 : i64} {
  func.func @kernel(%arg0: i32, %arg1: memref<128x128xbf16, #tpu.memory_space<vmem>>, %arg2: memref<1x128x128xbf16, #tpu.memory_space<vmem>>, %arg3: memref<128x128xf32, #tpu.memory_space<vmem>>, %arg4: memref<128x384xbf16, #tpu.memory_space<vmem>>, %arg5: memref<128x256xbf16, #tpu.memory_space<vmem>>, %arg6: memref<128x128xbf16, #tpu.memory_space<vmem>>, %arg7: memref<1x256xf32, #tpu.memory_space<vmem>>, %arg8: memref<1x128xf32, #tpu.memory_space<vmem>>, %arg9: memref<128x128xbf16, #tpu.memory_space<vmem>>, %arg10: memref<1x128xf32, #tpu.memory_space<vmem>>, %arg11: memref<1x128x128xf32, #tpu.memory_space<vmem>>, %arg12: memref<128x128xf32, #tpu.memory_space<vmem>>) attributes {dimension_semantics = [#tpu.dimension_semantics<arbitrary>], iteration_bounds = array<i64: 8>, scalar_prefetch = 0 : i64, scratch_operands = 0 : i64, tpu.core_type = #tpu.core_type<tc>, window_params = [{pipeline_mode = #tpu.pipeline_mode<synchronous>, transform_indices = @transform_0, window_bounds = array<i64: 128, 128>}, {transform_indices = @transform_1, window_bounds = array<i64: 1, 128, 128>}, {pipeline_mode = #tpu.pipeline_mode<synchronous>, transform_indices = @transform_2, window_bounds = array<i64: 128, 128>}, {pipeline_mode = #tpu.pipeline_mode<synchronous>, transform_indices = @transform_3, window_bounds = array<i64: 128, 384>}, {pipeline_mode = #tpu.pipeline_mode<synchronous>, transform_indices = @transform_4, window_bounds = array<i64: 128, 256>}, {pipeline_mode = #tpu.pipeline_mode<synchronous>, transform_indices = @transform_5, window_bounds = array<i64: 128, 128>}, {pipeline_mode = #tpu.pipeline_mode<synchronous>, transform_indices = @transform_6, window_bounds = array<i64: 1, 256>}, {pipeline_mode = #tpu.pipeline_mode<synchronous>, transform_indices = @transform_7, window_bounds = array<i64: 1, 128>}, {pipeline_mode = #tpu.pipeline_mode<synchronous>, transform_indices = @transform_8, window_bounds = array<i64: 128, 128>}, {pipeline_mode = #tpu.pipeline_mode<synchronous>, transform_indices = @transform_9, window_bounds = array<i64: 1, 128>}, {transform_indices = @transform_10, window_bounds = array<i64: 1, 128, 128>}, {pipeline_mode = #tpu.pipeline_mode<synchronous>, transform_indices = @transform_11, window_bounds = array<i64: 128, 128>}]} {
    %c0_i32 = arith.constant 0 : i32
    %0 = arith.cmpi eq, %arg0, %c0_i32 : i32
    %1 = arith.extui %0 : i1 to i32
    %c0_i32_0 = arith.constant 0 : i32
    %2 = arith.cmpi ne, %1, %c0_i32_0 : i32
    scf.if %2 {
      %c0_33 = arith.constant 0 : index
      %c0_34 = arith.constant 0 : index
      %53 = vector.load %arg3[%c0_33, %c0_34] : memref<128x128xf32, #tpu.memory_space<vmem>>, vector<128x128xf32>
      %c0_35 = arith.constant 0 : index
      %c0_36 = arith.constant 0 : index
      %54 = vector.load %arg12[%c0_35, %c0_36] : memref<128x128xf32, #tpu.memory_space<vmem>>, vector<128x128xf32>
      tpu.vector_store %arg12[%c0_35, %c0_36], %53 {strides = array<i32>} : memref<128x128xf32, #tpu.memory_space<vmem>>, vector<128x128xf32>,
    } else {
    }
    %c0 = arith.constant 0 : index
    %c0_1 = arith.constant 0 : index
    %3 = vector.load %arg12[%c0, %c0_1] : memref<128x128xf32, #tpu.memory_space<vmem>>, vector<128x128xf32>
    %4 = arith.truncf %3 : vector<128x128xf32> to vector<128x128xbf16>
    %c0_2 = arith.constant 0 : index
    %c0_3 = arith.constant 0 : index
    %5 = vector.load %arg1[%c0_2, %c0_3] : memref<128x128xbf16, #tpu.memory_space<vmem>>, vector<128x128xbf16>
    %c0_4 = arith.constant 0 : index
    %c0_5 = arith.constant 0 : index
    %c0_6 = arith.constant 0 : index
    %6 = vector.load %arg2[%c0_4, %c0_5, %c0_6] : memref<1x128x128xbf16, #tpu.memory_space<vmem>>, vector<1x128x128xbf16>
    %7 = vector.shape_cast %6 : vector<1x128x128xbf16> to vector<128x128xbf16>
    %cst = arith.constant dense<0.000000e+00> : vector<128x128xf32>
    %8 = tpu.matmul %5, %7, %cst {dimension_numbers = #tpu.dot_dimension_numbers<[1], [0], [0], [1], [0, 0, 1, 1], [], []>} : vector<128x128xbf16>, vector<128x128xbf16>, vector<128x128xf32> -> vector<128x128xf32>
    %9 = arith.truncf %8 : vector<128x128xf32> to vector<128x128xbf16>
    %c0_7 = arith.constant 0 : index
    %c0_8 = arith.constant 0 : index
    %10 = vector.load %arg4[%c0_7, %c0_8] : memref<128x384xbf16, #tpu.memory_space<vmem>>, vector<128x384xbf16>
    %cst_9 = arith.constant dense<0.000000e+00> : vector<128x384xf32>
    %11 = tpu.matmul %9, %10, %cst_9 {dimension_numbers = #tpu.dot_dimension_numbers<[1], [0], [0], [1], [0, 0, 1, 1], [], []>} : vector<128x128xbf16>, vector<128x384xbf16>, vector<128x384xf32> -> vector<128x384xf32>
    %c0_10 = arith.constant 0 : index
    %c0_11 = arith.constant 0 : index
    %12 = vector.load %arg5[%c0_10, %c0_11] : memref<128x256xbf16, #tpu.memory_space<vmem>>, vector<128x256xbf16>
    %cst_12 = arith.constant dense<0.000000e+00> : vector<128x256xf32>
    %13 = tpu.matmul %4, %12, %cst_12 {dimension_numbers = #tpu.dot_dimension_numbers<[1], [0], [0], [1], [0, 0, 1, 1], [], []>} : vector<128x128xbf16>, vector<128x256xbf16>, vector<128x256xf32> -> vector<128x256xf32>
    %14 = vector.extract_strided_slice %11 {offsets = [0, 0], sizes = [128, 256], strides = [1, 1]} : vector<128x384xf32> to vector<128x256xf32>
    %15 = arith.addf %14, %13 : vector<128x256xf32>
    %c0_13 = arith.constant 0 : index
    %c0_14 = arith.constant 0 : index
    %16 = vector.load %arg7[%c0_13, %c0_14] : memref<1x256xf32, #tpu.memory_space<vmem>>, vector<1x256xf32>
    %17 = vector.broadcast %16 : vector<1x256xf32> to vector<128x256xf32>
    %18 = arith.addf %15, %17 : vector<128x256xf32>
    %19 = arith.negf %18 : vector<128x256xf32>
    %20 = math.exp %19 : vector<128x256xf32>
    %cst_15 = arith.constant 1.000000e+00 : f32
    %21 = vector.broadcast %cst_15 : f32 to vector<128x256xf32>
    %22 = arith.addf %21, %20 : vector<128x256xf32>
    %23 = arith.divf %21, %22 : vector<128x256xf32>
    %24 = vector.extract_strided_slice %23 {offsets = [0, 0], sizes = [128, 128], strides = [1, 1]} : vector<128x256xf32> to vector<128x128xf32>
    %25 = vector.extract_strided_slice %23 {offsets = [0, 128], sizes = [128, 128], strides = [1, 1]} : vector<128x256xf32> to vector<128x128xf32>
    %26 = arith.mulf %3, %25 : vector<128x128xf32>
    %27 = arith.truncf %26 : vector<128x128xf32> to vector<128x128xbf16>
    %28 = vector.extract_strided_slice %11 {offsets = [0, 256], sizes = [128, 128], strides = [1, 1]} : vector<128x384xf32> to vector<128x128xf32>
    %c0_16 = arith.constant 0 : index
    %c0_17 = arith.constant 0 : index
    %29 = vector.load %arg6[%c0_16, %c0_17] : memref<128x128xbf16, #tpu.memory_space<vmem>>, vector<128x128xbf16>
    %cst_18 = arith.constant dense<0.000000e+00> : vector<128x128xf32>
    %30 = tpu.matmul %27, %29, %cst_18 {dimension_numbers = #tpu.dot_dimension_numbers<[1], [0], [0], [1], [0, 0, 1, 1], [], []>} : vector<128x128xbf16>, vector<128x128xbf16>, vector<128x128xf32> -> vector<128x128xf32>
    %31 = arith.addf %28, %30 : vector<128x128xf32>
    %c0_19 = arith.constant 0 : index
    %c0_20 = arith.constant 0 : index
    %32 = vector.load %arg8[%c0_19, %c0_20] : memref<1x128xf32, #tpu.memory_space<vmem>>, vector<1x128xf32>
    %33 = vector.broadcast %32 : vector<1x128xf32> to vector<128x128xf32>
    %34 = arith.addf %31, %33 : vector<128x128xf32>
    %35 = math.tanh %34 : vector<128x128xf32>
    %36 = arith.mulf %24, %3 : vector<128x128xf32>
    %cst_21 = arith.constant 1.000000e+00 : f32
    %37 = vector.broadcast %cst_21 : f32 to vector<128x128xf32>
    %38 = arith.subf %37, %24 : vector<128x128xf32>
    %39 = arith.mulf %38, %35 : vector<128x128xf32>
    %40 = arith.addf %36, %39 : vector<128x128xf32>
    %c0_22 = arith.constant 0 : index
    %c0_23 = arith.constant 0 : index
    %41 = vector.load %arg12[%c0_22, %c0_23] : memref<128x128xf32, #tpu.memory_space<vmem>>, vector<128x128xf32>
    tpu.vector_store %arg12[%c0_22, %c0_23], %40 {strides = array<i32>} : memref<128x128xf32, #tpu.memory_space<vmem>>, vector<128x128xf32>,
    %cst_24 = arith.constant 0.000000e+00 : f32
    %42 = vector.broadcast %cst_24 : f32 to vector<128x128xf32>
    %43 = arith.maximumf %40, %42 : vector<128x128xf32>
    %44 = arith.truncf %43 : vector<128x128xf32> to vector<128x128xbf16>
    %c0_25 = arith.constant 0 : index
    %c0_26 = arith.constant 0 : index
    %45 = vector.load %arg9[%c0_25, %c0_26] : memref<128x128xbf16, #tpu.memory_space<vmem>>, vector<128x128xbf16>
    %cst_27 = arith.constant dense<0.000000e+00> : vector<128x128xf32>
    %46 = tpu.matmul %44, %45, %cst_27 {dimension_numbers = #tpu.dot_dimension_numbers<[1], [0], [0], [1], [0, 0, 1, 1], [], []>} : vector<128x128xbf16>, vector<128x128xbf16>, vector<128x128xf32> -> vector<128x128xf32>
    %c0_28 = arith.constant 0 : index
    %c0_29 = arith.constant 0 : index
    %47 = vector.load %arg10[%c0_28, %c0_29] : memref<1x128xf32, #tpu.memory_space<vmem>>, vector<1x128xf32>
    %48 = vector.broadcast %47 : vector<1x128xf32> to vector<128x128xf32>
    %49 = arith.addf %46, %48 : vector<128x128xf32>
    %c0_30 = arith.constant 0 : index
    %c0_31 = arith.constant 0 : index
    %c0_32 = arith.constant 0 : index
    %50 = vector.load %arg11[%c0_30, %c0_31, %c0_32] : memref<1x128x128xf32, #tpu.memory_space<vmem>>, vector<1x128x128xf32>
    %51 = vector.shape_cast %50 : vector<1x128x128xf32> to vector<128x128xf32>
    %52 = vector.shape_cast %49 : vector<128x128xf32> to vector<1x128x128xf32>
    tpu.vector_store %arg11[%c0_30, %c0_31, %c0_32], %52 {strides = array<i32>} : memref<1x128x128xf32, #tpu.memory_space<vmem>>, vector<1x128x128xf32>,
    return
  }
  func.func @transform_0(%arg0: i32) -> (i32, i32) {
    %c0_i32 = arith.constant 0 : i32
    %c0_i32_0 = arith.constant 0 : i32
    %c0_i32_1 = arith.constant 0 : i32
    return %c0_i32, %c0_i32_0 : i32, i32
  }
  func.func @transform_1(%arg0: i32) -> (i32, i32, i32) {
    %c0_i32 = arith.constant 0 : i32
    %c0_i32_0 = arith.constant 0 : i32
    %c0_i32_1 = arith.constant 0 : i32
    return %arg0, %c0_i32, %c0_i32_0 : i32, i32, i32
  }
  func.func @transform_2(%arg0: i32) -> (i32, i32) {
    %c0_i32 = arith.constant 0 : i32
    %c0_i32_0 = arith.constant 0 : i32
    %c0_i32_1 = arith.constant 0 : i32
    return %c0_i32, %c0_i32_0 : i32, i32
  }
  func.func @transform_3(%arg0: i32) -> (i32, i32) {
    %c0_i32 = arith.constant 0 : i32
    %c0_i32_0 = arith.constant 0 : i32
    %c0_i32_1 = arith.constant 0 : i32
    return %c0_i32, %c0_i32_0 : i32, i32
  }
  func.func @transform_4(%arg0: i32) -> (i32, i32) {
    %c0_i32 = arith.constant 0 : i32
    %c0_i32_0 = arith.constant 0 : i32
    %c0_i32_1 = arith.constant 0 : i32
    return %c0_i32, %c0_i32_0 : i32, i32
  }
  func.func @transform_5(%arg0: i32) -> (i32, i32) {
    %c0_i32 = arith.constant 0 : i32
    %c0_i32_0 = arith.constant 0 : i32
    %c0_i32_1 = arith.constant 0 : i32
    return %c0_i32, %c0_i32_0 : i32, i32
  }
  func.func @transform_6(%arg0: i32) -> (i32, i32) {
    %c0_i32 = arith.constant 0 : i32
    %c0_i32_0 = arith.constant 0 : i32
    %c0_i32_1 = arith.constant 0 : i32
    return %c0_i32, %c0_i32_0 : i32, i32
  }
  func.func @transform_7(%arg0: i32) -> (i32, i32) {
    %c0_i32 = arith.constant 0 : i32
    %c0_i32_0 = arith.constant 0 : i32
    %c0_i32_1 = arith.constant 0 : i32
    return %c0_i32, %c0_i32_0 : i32, i32
  }
  func.func @transform_8(%arg0: i32) -> (i32, i32) {
    %c0_i32 = arith.constant 0 : i32
    %c0_i32_0 = arith.constant 0 : i32
    %c0_i32_1 = arith.constant 0 : i32
    return %c0_i32, %c0_i32_0 : i32, i32
  }
  func.func @transform_9(%arg0: i32) -> (i32, i32) {
    %c0_i32 = arith.constant 0 : i32
    %c0_i32_0 = arith.constant 0 : i32
    %c0_i32_1 = arith.constant 0 : i32
    return %c0_i32, %c0_i32_0 : i32, i32
  }
  func.func @transform_10(%arg0: i32) -> (i32, i32, i32) {
    %c0_i32 = arith.constant 0 : i32
    %c0_i32_0 = arith.constant 0 : i32
    %c0_i32_1 = arith.constant 0 : i32
    return %arg0, %c0_i32, %c0_i32_0 : i32, i32, i32
  }
  func.func @transform_11(%arg0: i32) -> (i32, i32) {
    %c0_i32 = arith.constant 0 : i32
    %c0_i32_0 = arith.constant 0 : i32
    %c0_i32_1 = arith.constant 0 : i32
    return %c0_i32, %c0_i32_0 : i32, i32
  }
}

</mosaic_0001>

<bundles_post_ra>
// kernel: stgraph_tgcn_forward.1
= control target key start
LH: loop header
LB: loop body
LE: loop exit
PB: predicated region body
PF: predicated region fallthrough
CT: control target
= control target key end

     0   :  { %s2763_s17 = smov 0   ;;  %s3501_s0 = inlined_call_operand.vmem [shape: bf16[128,128], index: 0, kind: input, shape index: {}]   ;;  %s3502_s1 = inlined_call_operand.vmem [shape: bf16[8,128,128], index: 1, kind: input, shape index: {}]   ;;  %s3503_s2 = inlined_call_operand.vmem [shape: f32[128,128], index: 2, kind: input, shape index: {}, may-alias: {2,11}]   ;;  %s3504_s3 = inlined_call_operand.vmem [shape: bf16[128,384], index: 3, kind: input, shape index: {}]   ;;  %s3505_s4 = inlined_call_operand.vmem [shape: bf16[128,256], index: 4, kind: input, shape index: {}]   ;;  %s3506_s5 = inlined_call_operand.vmem [shape: bf16[128,128], index: 5, kind: input, shape index: {}]   ;;  %s3507_s6 = inlined_call_operand.vmem [shape: f32[1,256], index: 6, kind: input, shape index: {}]   ;;  %s3508_s7 = inlined_call_operand.vmem [shape: f32[1,128], index: 7, kind: input, shape index: {}]   ;;  %s3509_s8 = inlined_call_operand.vmem [shape: bf16[128,128], index: 8, kind: input, shape index: {}]   ;;  %s3510_s9 = inlined_call_operand.vmem [shape: f32[1,128], index: 9, kind: input, shape index: {}]   ;;  %s3511_s10 = inlined_call_operand.vmem [shape: f32[8,128,128], index: 10, kind: output, shape index: {0}]   ;;  %s3512_s11 = inlined_call_operand.vmem [shape: f32[128,128], index: 11, kind: output, shape index: {1}, may-alias: {2,11}]  }
   0x1 LB: > { %s2115_s18 = sadd.s32 4294967295, %s2700_s17   ;;  %p2119_p0 = scmp.ge.s32.totalorder %s2700_s17, 1  ;;  %s2700_s17 = sphi %s2763_s17, %s22_s17  }
   0x2   : > { %p335_p1 = scmp.lt.s32.totalorder %s2700_s17, 9 }
   0x4   : > { %p336_p2 = pnand %p2119_p0, %p335_p1 }
   0x6   : > { %339 = sbr.rel (%p336_p2) target bundleno = 1057 (0x421), region = 60 }
   0xb   : > { %p375_p3 = scmp.lt.s32.totalorder %s2115_s18, 7  ;;  %p2124_p4 = scmp.ne.s32.totalorder %s2115_s18, 0 }
   0xd   : > { %s376_s19 = scalar_select %p375_p3, %s2115_s18, 7 }
   0xe   : > { %389 = sbr.rel (%p2124_p4) target bundleno = 66 (0x42), region = 64 }
   0xf   : > { %s2233_s20 = sshll.u32 %s376_s19, 6  ;;  %s2234_s21 = sshll.u32 %s376_s19, 7 }
  0x10   : > { %s2774_s24 = scalar_lea.vmem %s3502_s1, %s2233_s20  ;;  %s2779_s27 = scalar_lea.vmem %s3511_s10, %s2234_s21 }
  0x13   : > { %v390_v0 = vld [vmem:[%s3503_s2] sm:$0xff]  ;;  %v391_v1 = vld [vmem:[%s3503_s2 + $0x8] sm:$0xff]  ;;  %v392_v2 = vld [vmem:[%s3503_s2 + $0x10] sm:$0xff] }
  0x14   : > { %406 = vst [vmem:[%s3512_s11] sm:$0xff] %v390_v0  ;;  %407 = vst [vmem:[%s3512_s11 + $0x8] sm:$0xff] %v391_v1 }
  0x15   : > { %408 = vst [vmem:[%s3512_s11 + $0x10] sm:$0xff] %v392_v2 }
  0x1c   : > { %v393_v3 = vld [vmem:[%s3503_s2 + $0x18] sm:$0xff]  ;;  %v394_v4 = vld [vmem:[%s3503_s2 + $0x20] sm:$0xff]  ;;  %v395_v5 = vld [vmem:[%s3503_s2 + $0x28] sm:$0xff] }
  0x1d   : > { %409 = vst [vmem:[%s3512_s11 + $0x18] sm:$0xff] %v393_v3  ;;  %410 = vst [vmem:[%s3512_s11 + $0x20] sm:$0xff] %v394_v4 }
  0x1e   : > { %411 = vst [vmem:[%s3512_s11 + $0x28] sm:$0xff] %v395_v5 }
  0x25   : > { %v396_v6 = vld [vmem:[%s3503_s2 + $0x30] sm:$0xff]  ;;  %v397_v7 = vld [vmem:[%s3503_s2 + $0x38] sm:$0xff]  ;;  %v398_v8 = vld [vmem:[%s3503_s2 + $0x40] sm:$0xff] }
  0x26   : > { %412 = vst [vmem:[%s3512_s11 + $0x30] sm:$0xff] %v396_v6  ;;  %413 = vst [vmem:[%s3512_s11 + $0x38] sm:$0xff] %v397_v7 }
  0x27   : > { %414 = vst [vmem:[%s3512_s11 + $0x40] sm:$0xff] %v398_v8 }
  0x2e   : > { %v399_v9 = vld [vmem:[%s3503_s2 + $0x48] sm:$0xff]  ;;  %v400_v10 = vld [vmem:[%s3503_s2 + $0x50] sm:$0xff]  ;;  %v401_v11 = vld [vmem:[%s3503_s2 + $0x58] sm:$0xff] }
  0x2f   : > { %415 = vst [vmem:[%s3512_s11 + $0x48] sm:$0xff] %v399_v9  ;;  %416 = vst [vmem:[%s3512_s11 + $0x50] sm:$0xff] %v400_v10 }
  0x30   : > { %417 = vst [vmem:[%s3512_s11 + $0x58] sm:$0xff] %v401_v11 }
  0x37   : > { %v402_v12 = vld [vmem:[%s3503_s2 + $0x60] sm:$0xff]  ;;  %v403_v13 = vld [vmem:[%s3503_s2 + $0x68] sm:$0xff]  ;;  %v404_v14 = vld [vmem:[%s3503_s2 + $0x70] sm:$0xff] }
  0x38   : > { %418 = vst [vmem:[%s3512_s11 + $0x60] sm:$0xff] %v402_v12  ;;  %419 = vst [vmem:[%s3512_s11 + $0x68] sm:$0xff] %v403_v13 }
  0x39   : > { %420 = vst [vmem:[%s3512_s11 + $0x70] sm:$0xff] %v404_v14 }
  0x40   : > { %v405_v15 = vld [vmem:[%s3503_s2 + $0x78] sm:$0xff] }
  0x41   : > { %421 = vst [vmem:[%s3512_s11 + $0x78] sm:$0xff] %v405_v15 }
  0x42 PF: > { %v2436_v16 = vld [vmem:[%s2774_s24 + $0x38] sm:$0xff]   ;;  %v2437_v17 = vld [vmem:[%s2774_s24 + $0x30] sm:$0xff]   ;;  %v2438_v18 = vld [vmem:[%s2774_s24 + $0x28] sm:$0xff]   ;;  %v2702_v56 = vmov 0  }
  0x43   : > { %2299 = vmatprep.subr.bf16.mxu0 %v2436_v16  ;;  %v2439_v19 = vld [vmem:[%s2774_s24 + $0x20] sm:$0xff]   ;;  %v2440_v21 = vld [vmem:[%s2774_s24 + $0x18] sm:$0xff]   ;;  %v2441_v22 = vld [vmem:[%s2774_s24 + $0x10] sm:$0xff]   ;;  %871 = vmatprep.mubr.bf16.mxu1 %v2702_v56 }
  0x44   : > { %2300 = vmatpush3.bf16.msra.mxu0 %v2436_v16  ;;  %v2444_v20 = vld [vmem:[%s3501_s0] sm:$0xff]   ;;  %v2452_v23 = vld [vmem:[%s3504_s3 + $0xac] ss:$12 sps:$4 sm:$0xff]   ;;  %v2455_v24 = vld [vmem:[%s3504_s3 + $0xa8] ss:$12 sps:$4 sm:$0xff]  }
  0x45   : > { %2301 = vmatprep.subr.bf16.mxu0 %v2437_v17  ;;  %2315 = vmatprep.mubr.bf16.mxu0 %v2444_v20  ;;  %v2456_v25 = vld [vmem:[%s3504_s3 + $0x94] ss:$12 sps:$4 sm:$0xff]   ;;  %v2442_v26 = vld [vmem:[%s2774_s24 + $0x8] sm:$0xff]   ;;  %v2459_v27 = vld [vmem:[%s3504_s3 + $0x90] ss:$12 sps:$4 sm:$0xff]  }
  0x46   : > { %839 = vmatprep.subr.bf16.mxu1 %v2452_v23  ;;  %v2460_v28 = vld [vmem:[%s3504_s3 + $0x7c] ss:$12 sps:$4 sm:$0xff]   ;;  %v2443_v29 = vld [vmem:[%s2774_s24] sm:$0xff]   ;;  %v2446_v35 = vld [vmem:[%s3501_s0 + $0x10] sm:$0xff]  }
  0x47   : > { %840 = vmatpush1.bf16.msra.mxu1 %v2455_v24  ;;  %v2463_v30 = vld [vmem:[%s3504_s3 + $0x78] ss:$12 sps:$4 sm:$0xff]   ;;  %v2454_v32 = vld [vmem:[%s3504_s3 + $0xb0] ss:$12 sps:$4 sm:$0xff]   ;;  %v2445_v33 = vld [vmem:[%s3501_s0 + $0x8] sm:$0xff]  }
  0x48   : > { %2302 = vmatpush3.bf16.msra.mxu0 %v2437_v17  ;;  %841 = vmatprep.subr.bf16.mxu1 %v2456_v25  ;;  %v2464_v31 = vld [vmem:[%s3504_s3 + $0x64] ss:$12 sps:$4 sm:$0xff]   ;;  %v2467_v34 = vld [vmem:[%s3504_s3 + $0x60] ss:$12 sps:$4 sm:$0xff]   ;;  %v2471_v38 = vld [vmem:[%s3504_s3 + $0x48] ss:$12 sps:$4 sm:$0xff]  }
  0x49   : > { %2303 = vmatprep.subr.bf16.mxu0 %v2438_v18  ;;  %v2468_v36 = vld [vmem:[%s3504_s3 + $0x4c] ss:$12 sps:$4 sm:$0xff]   ;;  %v2472_v39 = vld [vmem:[%s3504_s3 + $0x34] ss:$12 sps:$4 sm:$0xff]   ;;  %v2475_v41 = vld [vmem:[%s3504_s3 + $0x30] ss:$12 sps:$4 sm:$0xff]  }
  0x4a   : > { %v2458_v37 = vld [vmem:[%s3504_s3 + $0x98] ss:$12 sps:$4 sm:$0xff]   ;;  %v2462_v40 = vld [vmem:[%s3504_s3 + $0x80] ss:$12 sps:$4 sm:$0xff]   ;;  %v2466_v44 = vld [vmem:[%s3504_s3 + $0x68] ss:$12 sps:$4 sm:$0xff]  }
  0x4b   : > { %842 = vmatpush1.bf16.msra.mxu1 %v2459_v27  ;;  %v2447_v42 = vld [vmem:[%s3501_s0 + $0x18] sm:$0xff]   ;;  %v2448_v43 = vld [vmem:[%s3501_s0 + $0x20] sm:$0xff]   ;;  %v2449_v46 = vld [vmem:[%s3501_s0 + $0x28] sm:$0xff]  }
  0x4c   : > { %2304 = vmatpush3.bf16.msra.mxu0 %v2438_v18  ;;  %843 = vmatprep.subr.bf16.mxu1 %v2460_v28  ;;  %v2470_v45 = vld [vmem:[%s3504_s3 + $0x50] ss:$12 sps:$4 sm:$0xff]   ;;  %v2474_v48 = vld [vmem:[%s3504_s3 + $0x38] ss:$12 sps:$4 sm:$0xff]   ;;  %v2478_v51 = vld [vmem:[%s3504_s3 + $0x20] ss:$12 sps:$4 sm:$0xff]  }
  0x4d   : > { %2305 = vmatprep.subr.bf16.mxu0 %v2439_v19  ;;  %v2450_v47 = vld [vmem:[%s3501_s0 + $0x30] sm:$0xff]   ;;  %v2451_v49 = vld [vmem:[%s3501_s0 + $0x38] sm:$0xff]   ;;  %v2483_v55 = vld [vmem:[%s3504_s3] ss:$12 sps:$4 sm:$0xff]  }
  0x4e   : > { %v2476_v50 = vld [vmem:[%s3504_s3 + $0x1c] ss:$12 sps:$4 sm:$0xff]   ;;  %v2479_v52 = vld [vmem:[%s3504_s3 + $0x18] ss:$12 sps:$4 sm:$0xff]  }
  0x4f   : > { %844 = vmatpush1.bf16.msra.mxu1 %v2463_v30  ;;  %v2480_v53 = vld [vmem:[%s3504_s3 + $0x4] ss:$12 sps:$4 sm:$0xff]   ;;  %v2482_v54 = vld [vmem:[%s3504_s3 + $0x8] ss:$12 sps:$4 sm:$0xff]  }
  0x50   : > { %2306 = vmatpush3.bf16.msra.mxu0 %v2439_v19  ;;  %845 = vmatprep.subr.bf16.mxu1 %v2464_v31  ;;  %v2486_v57 = vld [vmem:[%s3505_s4 + $0x74] ss:$8 sps:$4 sm:$0xff]   ;;  %v2484_v63 = vld [vmem:[%s3505_s4 + $0x70] ss:$8 sps:$4 sm:$0xff]   ;;  %v2489_v2 = vld [vmem:[%s3505_s4 + $0x64] ss:$8 sps:$4 sm:$0xff]  }
  0x51   : > { %2307 = vmatprep.subr.bf16.mxu0 %v2440_v21  ;;  %v2487_v4 = vld [vmem:[%s3505_s4 + $0x60] ss:$8 sps:$4 sm:$0xff]   ;;  %v2492_v6 = vld [vmem:[%s3505_s4 + $0x54] ss:$8 sps:$4 sm:$0xff]   ;;  %v2490_v9 = vld [vmem:[%s3505_s4 + $0x50] ss:$8 sps:$4 sm:$0xff]  }
  0x52   : > { %v2495_v12 = vld [vmem:[%s3505_s4 + $0x44] ss:$8 sps:$4 sm:$0xff]   ;;  %v2493_v14 = vld [vmem:[%s3505_s4 + $0x40] ss:$8 sps:$4 sm:$0xff]   ;;  %v2498_v16 = vld [vmem:[%s3505_s4 + $0x34] ss:$8 sps:$4 sm:$0xff]  }
  0x53   : > { %846 = vmatpush1.bf16.msra.mxu1 %v2467_v34  ;;  %v2496_v19 = vld [vmem:[%s3505_s4 + $0x30] ss:$8 sps:$4 sm:$0xff]   ;;  %v2499_v24 = vld [vmem:[%s3505_s4 + $0x20] ss:$8 sps:$4 sm:$0xff]   ;;  %v2507_v31 = vld [vmem:[%s3505_s4 + $0x4] ss:$8 sps:$4 sm:$0xff]  }
  0x54   : > { %2308 = vmatpush3.bf16.msra.mxu0 %v2440_v21  ;;  %847 = vmatprep.subr.bf16.mxu1 %v2468_v36  ;;  %v3043_v34 = vld [vmem:[%s3512_s11 + $0x8] sm:$0xff]  ;;  %v3052_v36 = vld [vmem:[%s3512_s11 + $0x10] sm:$0xff] }
  0x55   : > { %2309 = vmatprep.subr.bf16.mxu0 %v2441_v22 }
  0x57   : > { %848 = vmatpush1.bf16.msra.mxu1 %v2471_v38 }
  0x58   : > { %2310 = vmatpush3.bf16.msra.mxu0 %v2441_v22  ;;  %849 = vmatprep.subr.bf16.mxu1 %v2472_v39  ;;  %v2501_v22 = vld [vmem:[%s3505_s4 + $0x24] ss:$8 sps:$4 sm:$0xff]  }
  0x59   : > { %2311 = vmatprep.subr.bf16.mxu0 %v2442_v26  ;;  %v3066_v39 = vld [vmem:[%s3512_s11 + $0x20] sm:$0xff] }
  0x5b   : > { %850 = vmatpush1.bf16.msra.mxu1 %v2475_v41 }
  0x5c   : > { %2312 = vmatpush3.bf16.msra.mxu0 %v2442_v26  ;;  %851 = vmatprep.subr.bf16.mxu1 %v2476_v50  ;;  %v2504_v26 = vld [vmem:[%s3505_s4 + $0x14] ss:$8 sps:$4 sm:$0xff]  }
  0x5d   : > { %2313 = vmatprep.subr.bf16.mxu0 %v2443_v29 }
  0x5f   : > { %852 = vmatpush1.bf16.msra.mxu1 %v2479_v52  ;;  %v3124_v52 = vld [vmem:[%s3512_s11 + $0x68] sm:$0xff] }
  0x60   : > { %2314 = vmatpush3.bf16.msra.mxu0 %v2443_v29  ;;  %853 = vmatprep.subr.bf16.mxu1 %v2480_v53  ;;  %v2502_v29 = vld [vmem:[%s3505_s4 + $0x10] ss:$8 sps:$4 sm:$0xff]  }
  0x61   : > { %2331 = vmatprep.subr.bf16.mxu0 %v2454_v32 }
  0x63   : > { %2316 = vmatmul.mubr.bf16.vlgmr.msra.gmra.mxu0 %v2445_v33  ;;  %854 = vmatpush1.bf16.msra.mxu1 %v2483_v55  ;;  %v3038_v33 = vld [vmem:[%s3512_s11] sm:$0xff]  ;;  %v3137_v55 = vld [vmem:[%s3512_s11 + $0x78] sm:$0xff] }
  0x64   : > { %2319 = vmatprep.mubr.bf16.mxu0 %v2446_v35  ;;  %2332 = vmatpush3.bf16.msra.mxu0 %v2454_v32  ;;  %v2505_v32 = vld [vmem:[%s3505_s4] ss:$8 sps:$4 sm:$0xff]   ;;  %v438_v35 = vpack.c.bf16 %v3043_v34, %v3038_v33 }
  0x65   : > { %2333 = vmatprep.subr.bf16.mxu0 %v2458_v37 }
  0x68   : > { %2334 = vmatpush3.bf16.msra.mxu0 %v2458_v37  ;;  %v3057_v37 = vld [vmem:[%s3512_s11 + $0x18] sm:$0xff] }
  0x69   : > { %2335 = vmatprep.subr.bf16.mxu0 %v2462_v40  ;;  %v439_v38 = vpack.c.bf16 %v3057_v37, %v3052_v36 }
  0x6b   : > { %2320 = vmatmul.mubr.bf16.gmra.mxu0 %v2447_v42  ;;  %v3080_v42 = vld [vmem:[%s3512_s11 + $0x30] sm:$0xff] }
  0x6c   : > { %2323 = vmatprep.mubr.bf16.mxu0 %v2448_v43  ;;  %2336 = vmatpush3.bf16.msra.mxu0 %v2462_v40  ;;  %v3071_v40 = vld [vmem:[%s3512_s11 + $0x28] sm:$0xff]  ;;  %v3085_v43 = vld [vmem:[%s3512_s11 + $0x38] sm:$0xff] }
  0x6d   : > { %2337 = vmatprep.subr.bf16.mxu0 %v2466_v44  ;;  %v440_v41 = vpack.c.bf16 %v3071_v40, %v3066_v39 }
  0x70   : > { %2338 = vmatpush3.bf16.msra.mxu0 %v2466_v44  ;;  %v441_v44 = vpack.c.bf16 %v3085_v43, %v3080_v42 }
  0x71   : > { %2339 = vmatprep.subr.bf16.mxu0 %v2470_v45 }
  0x73   : > { %2324 = vmatmul.mubr.bf16.gmra.mxu0 %v2449_v46  ;;  %v3098_v46 = vld [vmem:[%s3512_s11 + $0x48] sm:$0xff] }
  0x74   : > { %2327 = vmatprep.mubr.bf16.mxu0 %v2450_v47  ;;  %2340 = vmatpush3.bf16.msra.mxu0 %v2470_v45  ;;  %v3093_v45 = vld [vmem:[%s3512_s11 + $0x40] sm:$0xff] }
  0x75   : > { %2341 = vmatprep.subr.bf16.mxu0 %v2474_v48  ;;  %v442_v47 = vpack.c.bf16 %v3098_v46, %v3093_v45 }
  0x78   : > { %2342 = vmatpush3.bf16.msra.mxu0 %v2474_v48  ;;  %v3106_v48 = vld [vmem:[%s3512_s11 + $0x50] sm:$0xff] }
  0x79   : > { %2343 = vmatprep.subr.bf16.mxu0 %v2478_v51 }
  0x7b   : > { %2328 = vmatmul.mubr.bf16.gmra.mxu0 %v2451_v49  ;;  %v3111_v49 = vld [vmem:[%s3512_s11 + $0x58] sm:$0xff] }
  0x7c   : > { %2344 = vmatpush3.bf16.msra.mxu0 %v2478_v51  ;;  %v443_v50 = vpack.c.bf16 %v3111_v49, %v3106_v48  ;;  %v3119_v51 = vld [vmem:[%s3512_s11 + $0x60] sm:$0xff] }
  0x7d   : > { %2345 = vmatprep.subr.bf16.mxu0 %v2482_v54  ;;  %v444_v53 = vpack.c.bf16 %v3124_v52, %v3119_v51 }
  0x80   : > { %2346 = vmatpush3.bf16.msra.mxu0 %v2482_v54  ;;  %v3132_v54 = vld [vmem:[%s3512_s11 + $0x70] sm:$0xff] }
  0x81   : > { %1145 = vmatprep.subr.bf16.mxu0 %v2486_v57  ;;  %v445_v57 = vpack.c.bf16 %v3137_v55, %v3132_v54 }
 0x123   : > { %v2317_v58 = vpop.f32.mrf.mxu0 }
 0x125   : > { %v608_v59 = vpop.f32.mrf.mxu0 }
 0x127   : > { %v2318_v60 = vpop.f32.mrf.mxu0 }
 0x128   : > { %v672_v0 = vpack.c.bf16 %v2318_v60, %v2317_v58  ;;  %v1292_v58 = vlaneseq }
 0x129   : > { %v611_v61 = vpop.f32.mrf.mxu0 }
 0x12a   : > { %v671_v62 = vpack.c.bf16 %v611_v61, %v608_v59  ;;  %v3141_v59 = vshrl.u32 %v1292_v58, 7 }
 0x12b   : > { %v2321_v1 = vpop.f32.mrf.mxu0 }
 0x12c   : > { %872 = vmatmul.mubr.bf16.vlgmr.msra.gmra.mxu1 %v671_v62  ;;  %2347 = vmatprep.mubr.bf16.mxu0 %v671_v62  ;;  %v1294_v60 = vsub.s32 0, %v3141_v59  ;;  %v2508_v62 = vld [vmem:[%s3506_s5 + $0x38] sm:$0xff]  }
 0x12d   : > { %v624_v3 = vpop.f32.mrf.mxu0  ;;  %2348 = vmatmul.mubr.bf16.vlgmr.msra.gmra.mxu0 %v672_v0  ;;  %881 = vmatprep.mubr.bf16.mxu1 %v2702_v56 }
 0x12e   : > { %1146 = vmatpush1.bf16.msra.mxu0 %v2484_v63  ;;  %2363 = vmatprep.subr.bf16.mxu1 %v2508_v62  ;;  %v2509_v63 = vld [vmem:[%s3506_s5 + $0x30] sm:$0xff]  }
 0x12f   : > { %v2322_v5 = vpop.f32.mrf.mxu0  ;;  %1147 = vmatprep.subr.bf16.mxu0 %v2489_v2  ;;  %2364 = vmatpush3.bf16.msra.mxu1 %v2508_v62  ;;  %v2512_v2 = vld [vmem:[%s3506_s5 + $0x18] sm:$0xff]  }
 0x130   : > { %v674_v10 = vpack.c.bf16 %v2322_v5, %v2321_v1  ;;  %2365 = vmatprep.subr.bf16.mxu1 %v2509_v63  ;;  %v2511_v1 = vld [vmem:[%s3506_s5 + $0x20] sm:$0xff]  }
 0x131   : > { %v627_v7 = vpop.f32.mrf.mxu0  ;;  %v2515_v5 = vld [vmem:[%s3506_s5] sm:$0xff]  }
 0x132   : > { %v673_v8 = vpack.c.bf16 %v627_v7, %v624_v3  ;;  %1148 = vmatpush1.bf16.msra.mxu0 %v2487_v4  ;;  %v2513_v3 = vld [vmem:[%s3506_s5 + $0x10] sm:$0xff]   ;;  %v2514_v4 = vld [vmem:[%s3506_s5 + $0x8] sm:$0xff]  }
 0x133   : > { %v2325_v11 = vpop.f32.mrf.mxu0  ;;  %1149 = vmatprep.subr.bf16.mxu0 %v2492_v6  ;;  %2366 = vmatpush3.bf16.msra.mxu1 %v2509_v63 }
 0x134   : > { %882 = vmatmul.mubr.bf16.gmra.mxu1 %v672_v0  ;;  %2351 = vmatprep.mubr.bf16.mxu0 %v673_v8  ;;  %v2510_v0 = vld [vmem:[%s3506_s5 + $0x28] sm:$0xff]  }
 0x135   : > { %v640_v13 = vpop.f32.mrf.mxu0  ;;  %2352 = vmatmul.mubr.bf16.gmra.mxu0 %v674_v10  ;;  %891 = vmatprep.mubr.bf16.mxu1 %v2702_v56 }
 0x136   : > { %1150 = vmatpush1.bf16.msra.mxu0 %v2490_v9  ;;  %2367 = vmatprep.subr.bf16.mxu1 %v2510_v0 }
 0x137   : > { %v2326_v15 = vpop.f32.mrf.mxu0  ;;  %1151 = vmatprep.subr.bf16.mxu0 %v2495_v12  ;;  %2368 = vmatpush3.bf16.msra.mxu1 %v2510_v0 }
 0x138   : > { %v676_v20 = vpack.c.bf16 %v2326_v15, %v2325_v11  ;;  %2369 = vmatprep.subr.bf16.mxu1 %v2511_v1 }
 0x139   : > { %v643_v17 = vpop.f32.mrf.mxu0 }
 0x13a   : > { %v675_v18 = vpack.c.bf16 %v643_v17, %v640_v13  ;;  %1152 = vmatpush1.bf16.msra.mxu0 %v2493_v14 }
 0x13b   : > { %v2329_v21 = vpop.f32.mrf.mxu0  ;;  %1153 = vmatprep.subr.bf16.mxu0 %v2498_v16  ;;  %2370 = vmatpush3.bf16.msra.mxu1 %v2511_v1 }
 0x13c   : > { %892 = vmatmul.mubr.bf16.gmra.mxu1 %v673_v8  ;;  %2355 = vmatprep.mubr.bf16.mxu0 %v675_v18 }
 0x13d   : > { %v656_v23 = vpop.f32.mrf.mxu0  ;;  %2356 = vmatmul.mubr.bf16.gmra.mxu0 %v676_v20  ;;  %901 = vmatprep.mubr.bf16.mxu1 %v2702_v56 }
 0x13e   : > { %1154 = vmatpush1.bf16.msra.mxu0 %v2496_v19  ;;  %2371 = vmatprep.subr.bf16.mxu1 %v2512_v2 }
 0x13f   : > { %v2330_v25 = vpop.f32.mrf.mxu0  ;;  %1155 = vmatprep.subr.bf16.mxu0 %v2501_v22  ;;  %2372 = vmatpush3.bf16.msra.mxu1 %v2512_v2 }
 0x140   : > { %v678_v30 = vpack.c.bf16 %v2330_v25, %v2329_v21  ;;  %2373 = vmatprep.subr.bf16.mxu1 %v2513_v3 }
 0x141   : > { %v659_v27 = vpop.f32.mrf.mxu0 }
 0x142   : > { %v677_v28 = vpack.c.bf16 %v659_v27, %v656_v23  ;;  %1156 = vmatpush1.bf16.msra.mxu0 %v2499_v24 }
 0x143   : > { %1157 = vmatprep.subr.bf16.mxu0 %v2504_v26  ;;  %2374 = vmatpush3.bf16.msra.mxu1 %v2513_v3 }
 0x144   : > { %902 = vmatmul.mubr.bf16.gmra.mxu1 %v674_v10  ;;  %2359 = vmatprep.mubr.bf16.mxu0 %v677_v28 }
 0x145   : > { %2360 = vmatmul.mubr.bf16.gmra.mxu0 %v678_v30  ;;  %911 = vmatprep.mubr.bf16.mxu1 %v2702_v56 }
 0x146   : > { %1158 = vmatpush1.bf16.msra.mxu0 %v2502_v29  ;;  %1177 = vmatprep.mubr.bf16.mxu0 %v2702_v56 }
 0x147   : > { %1159 = vmatprep.subr.bf16.mxu0 %v2507_v31  ;;  %2375 = vmatprep.subr.bf16.mxu1 %v2514_v4 }
 0x148   : > { %2376 = vmatpush3.bf16.msra.mxu1 %v2514_v4 }
 0x149   : > { %2377 = vmatprep.subr.bf16.mxu1 %v2515_v5 }
 0x14a   : > { %1160 = vmatpush1.bf16.msra.mxu0 %v2505_v32 }
 0x14c   : > { %912 = vmatmul.mubr.bf16.gmra.mxu1 %v675_v18 }
 0x14d   : > { %1178 = vmatmul.mubr.bf16.vlgmr.msra.gmra.mxu0 %v438_v35  ;;  %921 = vmatprep.mubr.bf16.mxu1 %v2702_v56 }
 0x14e   : > { %1187 = vmatprep.mubr.bf16.mxu0 %v2702_v56  ;;  %2378 = vmatpush3.bf16.msra.mxu1 %v2515_v5 }
 0x154   : > { %922 = vmatmul.mubr.bf16.gmra.mxu1 %v676_v20 }
 0x155   : > { %1188 = vmatmul.mubr.bf16.gmra.mxu0 %v439_v38  ;;  %931 = vmatprep.mubr.bf16.mxu1 %v2702_v56 }
 0x156   : > { %1197 = vmatprep.mubr.bf16.mxu0 %v2702_v56 }
 0x15c   : > { %932 = vmatmul.mubr.bf16.gmra.mxu1 %v677_v28 }
 0x15d   : > { %1198 = vmatmul.mubr.bf16.gmra.mxu0 %v440_v41  ;;  %941 = vmatprep.mubr.bf16.mxu1 %v2702_v56 }
 0x15e   : > { %1207 = vmatprep.mubr.bf16.mxu0 %v2702_v56 }
 0x164   : > { %942 = vmatmul.mubr.bf16.gmra.mxu1 %v678_v30 }
 0x165   : > { %1208 = vmatmul.mubr.bf16.gmra.mxu0 %v441_v44  ;;  %v1298_v44 = vsub.s32 1, %v3141_v59 }
 0x166   : > { %1217 = vmatprep.mubr.bf16.mxu0 %v2702_v56 }
 0x16d   : > { %1218 = vmatmul.mubr.bf16.gmra.mxu0 %v442_v47 }
 0x16e   : > { %1227 = vmatprep.mubr.bf16.mxu0 %v2702_v56 }
 0x175   : > { %1228 = vmatmul.mubr.bf16.gmra.mxu0 %v443_v50 }
 0x176   : > { %1237 = vmatprep.mubr.bf16.mxu0 %v2702_v56 }
 0x17d   : > { %1238 = vmatmul.mubr.bf16.gmra.mxu0 %v444_v53 }
 0x17e   : > { %1247 = vmatprep.mubr.bf16.mxu0 %v2702_v56  ;;  %v1290_v56 = vld [vmem:[%s3507_s6] sm:$0x3] }
 0x17f   : > { %v3147_v61 = vrot.slane %v1290_v56, %v1294_v60  ;;  %v3214_v58 = vrot.slane %v1290_v56, %v1298_v44 }
 0x185   : > { %1248 = vmatmul.mubr.bf16.gmra.mxu0 %v445_v57 }
 0x1ec   : > { %v873_v6 = vpop.f32.mrf.mxu1 }
 0x1ed   : > { %v3173_v7 = vpop.f32.mrf.mxu0 }
 0x1ee   : > { %v875_v8 = vpop.f32.mrf.mxu1 }
 0x1ef   : > { %v3175_v9 = vpop.f32.mrf.mxu0 }
 0x1f0   : > { %v877_v10 = vpop.f32.mrf.mxu1 }
 0x1f1   : > { %v3177_v11 = vpop.f32.mrf.mxu0 }
 0x1f2   : > { %v879_v12 = vpop.f32.mrf.mxu1 }
 0x1f3   : > { %v3179_v13 = vpop.f32.mrf.mxu0 }
 0x1f4   : > { %v883_v14 = vpop.f32.mrf.mxu1 }
 0x1f5   : > { %v3181_v15 = vpop.f32.mrf.mxu0 }
 0x1f6   : > { %v885_v16 = vpop.f32.mrf.mxu1 }
 0x1f7   : > { %v3183_v17 = vpop.f32.mrf.mxu0 }
 0x1f8   : > { %v887_v18 = vpop.f32.mrf.mxu1 }
 0x1f9   : > { %v3185_v19 = vpop.f32.mrf.mxu0 }
 0x1fa   : > { %v889_v20 = vpop.f32.mrf.mxu1 }
 0x1fb   : > { %v3187_v21 = vpop.f32.mrf.mxu0 }
 0x1fc   : > { %v893_v22 = vpop.f32.mrf.mxu1 }
 0x1fd   : > { %v3189_v23 = vpop.f32.mrf.mxu0 }
 0x1fe   : > { %v895_v24 = vpop.f32.mrf.mxu1 }
 0x1ff   : > { %v3191_v25 = vpop.f32.mrf.mxu0 }
 0x200   : > { %v897_v26 = vpop.f32.mrf.mxu1 }
 0x201   : > { %v3193_v27 = vpop.f32.mrf.mxu0 }
 0x202   : > { %3513 = vst [vmem:[#allocation2_spill] sm:$0xff] %v3193_v27  ;;  %v899_v28 = vpop.f32.mrf.mxu1 }
 0x203   : > { %v3195_v29 = vpop.f32.mrf.mxu0 }
 0x204   : > { %3514 = vst [vmem:[#allocation3_spill] sm:$0xff] %v3195_v29  ;;  %v3197_v30 = vpop.f32.mrf.mxu1 }
 0x205   : > { %v3199_v31 = vpop.f32.mrf.mxu0 }
 0x206   : > { %3515 = vst [vmem:[#allocation4_spill] sm:$0xff] %v3199_v31  ;;  %v3201_v32 = vpop.f32.mrf.mxu1 }
 0x207   : > { %v3203_v35 = vpop.f32.mrf.mxu0 }
 0x208   : > { %3516 = vst [vmem:[#allocation5_spill] sm:$0xff] %v3203_v35  ;;  %v3205_v38 = vpop.f32.mrf.mxu1 }
 0x209   : > { %v3207_v41 = vpop.f32.mrf.mxu0 }
 0x20a   : > { %3517 = vst [vmem:[#allocation6_spill] sm:$0xff] %v3207_v41  ;;  %v3210_v47 = vpop.f32.mrf.mxu1 }
 0x20b   : > { %v3212_v50 = vpop.f32.mrf.mxu0 }
 0x20c   : > { %3518 = vst [vmem:[#allocation7_spill] sm:$0xff] %v3212_v50  ;;  %v3216_v60 = vpop.f32.mrf.mxu1 }
 0x20d   : > { %v1179_v53 = vpop.f32.mrf.mxu0 }
 0x20e   : > { %v1258_v57 = vadd.f32 %v1179_v53, %v873_v6  ;;  %v3222_v59 = vpop.f32.mrf.mxu1 }
 0x20f   : > { %v1181_v62 = vpop.f32.mrf.mxu0 }
 0x210   : > { %v3219_v63 = vadd.f32 %v3147_v61, %v1258_v57  ;;  %v1259_v0 = vadd.f32 %v1181_v62, %v875_v8  ;;  %v3228_v57 = vpop.f32.mrf.mxu1 }
 0x211   : > { %v1183_v1 = vpop.f32.mrf.mxu0 }
 0x212   : > { %v1303_v2 = vadd.f32 %v3214_v58, %v1259_v0  ;;  %v1260_v3 = vadd.f32 %v1183_v1, %v877_v10  ;;  %v3234_v41 = vpop.f32.mrf.mxu1 }
 0x213   : > { %v1185_v4 = vpop.f32.mrf.mxu0 }
 0x214   : > { %v2182_v5 = vmul.f32 -1.442695, %v1303_v2  ;;  %v3225_v50 = vadd.f32 %v3147_v61, %v1260_v3  ;;  %v1261_v56 = vadd.f32 %v1185_v4, %v879_v12 }
 0x215   : > { %v1189_v6 = vpop.f32.mrf.mxu0 }
 0x216   : > { %2524 = vpow2.f32 %v2182_v5  ;;  %v1305_v44 = vadd.f32 %v3214_v58, %v1261_v56  ;;  %v1262_v53 = vadd.f32 %v1189_v6, %v883_v14 }
 0x217   : > { %v1191_v8 = vpop.f32.mrf.mxu0 }
 0x218   : > { %v2184_v62 = vmul.f32 -1.442695, %v1305_v44  ;;  %v3231_v0 = vadd.f32 %v3147_v61, %v1262_v53  ;;  %v1263_v10 = vadd.f32 %v1191_v8, %v885_v16  ;;  %v3240_v53 = vpop.f32.mrf.mxu1 }
 0x219   : > { %v1193_v1 = vpop.f32.mrf.mxu0 }
 0x21a   : > { %2526 = vpow2.f32 %v2184_v62  ;;  %v1307_v2 = vadd.f32 %v3214_v58, %v1263_v10  ;;  %v1264_v3 = vadd.f32 %v1193_v1, %v887_v18 }
 0x21b   : > { %v1195_v12 = vpop.f32.mrf.mxu0 }
 0x21c   : > { %v2186_v4 = vmul.f32 -1.442695, %v1307_v2  ;;  %v3237_v5 = vadd.f32 %v3147_v61, %v1264_v3  ;;  %v1265_v14 = vadd.f32 %v1195_v12, %v889_v20  ;;  %v3246_v3 = vpop.f32.mrf.mxu1 }
 0x21d   : > { %v1199_v56 = vpop.f32.mrf.mxu0 }
 0x21e   : > { %2528 = vpow2.f32 %v2186_v4  ;;  %v1309_v6 = vadd.f32 %v3214_v58, %v1265_v14  ;;  %v1266_v44 = vadd.f32 %v1199_v56, %v893_v22 }
 0x21f   : > { %v1201_v16 = vpop.f32.mrf.mxu0 }
 0x220   : > { %v2188_v8 = vmul.f32 -1.442695, %v1309_v6  ;;  %v3243_v62 = vadd.f32 %v3147_v61, %v1266_v44  ;;  %v1267_v18 = vadd.f32 %v1201_v16, %v895_v24 }
 0x221   : > { %v1203_v10 = vpop.f32.mrf.mxu0 }
 0x222   : > { %2530 = vpow2.f32 %v2188_v8  ;;  %v1311_v1 = vadd.f32 %v3214_v58, %v1267_v18  ;;  %v1268_v20 = vadd.f32 %v1203_v10, %v897_v26  ;;  %v927_v8 = vpop.f32.mrf.mxu1 }
 0x223   : > { %v2525_v2 = vpop.eup %2524  ;;  %v1205_v12 = vpop.f32.mrf.mxu0 }
 0x224   : > { %v2190_v4 = vmul.f32 -1.442695, %v1311_v1  ;;  %v1269_v14 = vadd.f32 %v1205_v12, %v899_v28  ;;  %v1431_v22 = vadd.f32 1.0, %v2525_v2  ;;  %v3249_v56 = vadd.f32 %v3147_v61, %v1268_v20  ;;  %v929_v20 = vpop.f32.mrf.mxu1 }
 0x225   : > { %v1209_v6 = vpop.f32.mrf.mxu0 }
 0x226   : > { %v1313_v44 = vadd.f32 %v3214_v58, %v1269_v14  ;;  %v1270_v24 = vadd.f32 %v1209_v6, %v3197_v30  ;;  %2532 = vpow2.f32 %v2190_v4 }
 0x227   : > { %v2527_v16 = vpop.eup %2526  ;;  %v1211_v18 = vpop.f32.mrf.mxu0  ;;  %2534 = vrcp.f32 %v1431_v22 }
 0x228   : > { %v1433_v35 = vadd.f32 1.0, %v2527_v16  ;;  %v2192_v31 = vmul.f32 -1.442695, %v1313_v44  ;;  %v3254_v26 = vadd.f32 %v3147_v61, %v1270_v24  ;;  %v1271_v28 = vadd.f32 %v1211_v18, %v3201_v32 }
 0x229   : > { %v1213_v10 = vpop.f32.mrf.mxu0 }
 0x22a   : > { %2536 = vrcp.f32 %v1433_v35  ;;  %v1272_v1 = vadd.f32 %v1213_v10, %v3205_v38  ;;  %v1315_v30 = vadd.f32 %v3214_v58, %v1271_v28  ;;  %v933_v35 = vpop.f32.mrf.mxu1 }
 0x22b   : > { %v2529_v2 = vpop.eup %2528  ;;  %2538 = vpow2.f32 %v2192_v31  ;;  %v1215_v12 = vpop.f32.mrf.mxu0 }
 0x22c   : > { %v3260_v4 = vadd.f32 %v3147_v61, %v1272_v1  ;;  %v1273_v14 = vadd.f32 %v1215_v12, %v3210_v47  ;;  %v1435_v6 = vadd.f32 1.0, %v2529_v2  ;;  %v2194_v44 = vmul.f32 -1.442695, %v1315_v30  ;;  %v935_v30 = vpop.f32.mrf.mxu1 }
 0x22d   : > { %v1219_v22 = vpop.f32.mrf.mxu0 }
 0x22e   : > { %v1317_v32 = vadd.f32 %v3214_v58, %v1273_v14  ;;  %2540 = vpow2.f32 %v2194_v44  ;;  %v1274_v38 = vadd.f32 %v1219_v22, %v3216_v60 }
 0x22f   : > { %v2531_v24 = vpop.eup %2530  ;;  %v1221_v16 = vpop.f32.mrf.mxu0  ;;  %2542 = vrcp.f32 %v1435_v6 }
 0x230   : > { %v1437_v31 = vadd.f32 1.0, %v2531_v24  ;;  %v2196_v18 = vmul.f32 -1.442695, %v1317_v32  ;;  %v1275_v28 = vadd.f32 %v1221_v16, %v3222_v59  ;;  %v3267_v10 = vadd.f32 %v3147_v61, %v1274_v38 }
 0x231   : > { %v1223_v47 = vpop.f32.mrf.mxu0 }
 0x232   : > { %2544 = vrcp.f32 %v1437_v31  ;;  %v1319_v1 = vadd.f32 %v3214_v58, %v1275_v28  ;;  %v1276_v2 = vadd.f32 %v1223_v47, %v3228_v57  ;;  %v937_v31 = vpop.f32.mrf.mxu1 }
 0x233   : > { %2546 = vpow2.f32 %v2196_v18  ;;  %v1225_v12 = vpop.f32.mrf.mxu0  ;;  %v2533_v14 = vpop.eup %2532 }
 0x234   : > { %v2198_v60 = vmul.f32 -1.442695, %v1319_v1  ;;  %v3272_v44 = vadd.f32 %v3147_v61, %v1276_v2  ;;  %v1277_v59 = vadd.f32 %v1225_v12, %v3234_v41  ;;  %v1439_v6 = vadd.f32 1.0, %v2533_v14  ;;  %v2535_v32 = vpop.eup %2534 }
 0x235   : > { %v1229_v22 = vpop.f32.mrf.mxu0  ;;  %v1526_v12 = vmul.f32 %v2535_v32, %v3038_v33 }
 0x236   : > { %v1321_v24 = vadd.f32 %v3214_v58, %v1277_v59  ;;  %v1278_v38 = vadd.f32 %v1229_v22, %v3240_v53  ;;  %2548 = vpow2.f32 %v2198_v60  ;;  %v939_v22 = vpop.f32.mrf.mxu1 }
 0x237   : > { %v2537_v16 = vpop.eup %2536  ;;  %v1231_v57 = vpop.f32.mrf.mxu0  ;;  %2550 = vrcp.f32 %v1439_v6 }
 0x238   : > { %v2539_v28 = vpop.eup %2538  ;;  %v2200_v18 = vmul.f32 -1.442695, %v1321_v24  ;;  %v3278_v47 = vadd.f32 %v3147_v61, %v1278_v38  ;;  %v1279_v1 = vadd.f32 %v1231_v57, %v3246_v3  ;;  %v1527_v14 = vmul.f32 %v2537_v16, %v3043_v34 }
 0x239   : > { %v1441_v41 = vadd.f32 1.0, %v2539_v28  ;;  %v1233_v2 = vpop.f32.mrf.mxu0 }
 0x23a   : > { %v1323_v53 = vadd.f32 %v3214_v58, %v1279_v1  ;;  %v1280_v59 = vadd.f32 %v1233_v2, %v927_v8  ;;  %v1542_v60 = vpack.c.bf16 %v1527_v14, %v1526_v12  ;;  %v943_v8 = vpop.f32.mrf.mxu1 }
 0x23b   : > { %2552 = vrcp.f32 %v1441_v41  ;;  %v1235_v29 = vpop.f32.mrf.mxu0  ;;  %v2541_v24 = vpop.eup %2540 }
 0x23c   : > { %2554 = vpow2.f32 %v2200_v18  ;;  %v2202_v38 = vmul.f32 -1.442695, %v1323_v53  ;;  %v3285_v27 = vadd.f32 %v3147_v61, %v1280_v59  ;;  %v1281_v3 = vadd.f32 %v1235_v29, %v929_v20  ;;  %2379 = vmatprep.mubr.bf16.mxu1 %v1542_v60  ;;  %v2543_v32 = vpop.eup %2542 }
 0x23d   : > { %v1443_v6 = vadd.f32 1.0, %v2541_v24  ;;  %v1239_v57 = vpop.f32.mrf.mxu0  ;;  %v1528_v20 = vmul.f32 %v2543_v32, %v3052_v36  ;;  %v945_v24 = vpop.f32.mrf.mxu1 }
 0x23e   : > { %v1325_v16 = vadd.f32 %v3214_v58, %v1281_v3  ;;  %v1282_v28 = vadd.f32 %v1239_v57, %v933_v35  ;;  %2556 = vpow2.f32 %v2202_v38 }
 0x23f   : > { %v2545_v1 = vpop.eup %2544  ;;  %v1241_v2 = vpop.f32.mrf.mxu0  ;;  %2558 = vrcp.f32 %v1443_v6 }
 0x240   : > { %v2547_v41 = vpop.eup %2546  ;;  %v2204_v12 = vmul.f32 -1.442695, %v1325_v16  ;;  %v3289_v18 = vadd.f32 %v3147_v61, %v1282_v28  ;;  %v1283_v14 = vadd.f32 %v1241_v2, %v935_v30  ;;  %v1529_v59 = vmul.f32 %v2545_v1, %v3057_v37  ;;  %v947_v1 = vpop.f32.mrf.mxu1 }
 0x241   : > { %v1445_v53 = vadd.f32 1.0, %v2547_v41  ;;  %v1243_v29 = vpop.f32.mrf.mxu0 }
 0x242   : > { %v1327_v60 = vadd.f32 %v3214_v58, %v1283_v14  ;;  %v1284_v35 = vadd.f32 %v1243_v29, %v937_v31  ;;  %v1543_v57 = vpack.c.bf16 %v1529_v59, %v1528_v20 }
 0x243   : > { %2560 = vrcp.f32 %v1445_v53  ;;  %v1245_v3 = vpop.f32.mrf.mxu0  ;;  %v2549_v30 = vpop.eup %2548 }
 0x244   : > { %2562 = vpow2.f32 %v2204_v12  ;;  %v2206_v38 = vmul.f32 -1.442695, %v1327_v60  ;;  %v3295_v16 = vadd.f32 %v3147_v61, %v1284_v35  ;;  %v1285_v6 = vadd.f32 %v1245_v3, %v939_v22  ;;  %2380 = vmatmul.mubr.bf16.vlgmr.msra.gmra.mxu1 %v1543_v57  ;;  %v2551_v2 = vpop.eup %2550  ;;  %v949_v57 = vpop.f32.mrf.mxu1 }
 0x245   : > { %v1249_v28 = vpop.f32.mrf.mxu0  ;;  %v1447_v32 = vadd.f32 1.0, %v2549_v30  ;;  %v1530_v22 = vmul.f32 %v2551_v2, %v3066_v39 }
 0x246   : > { %v1286_v41 = vadd.f32 %v1249_v28, %v943_v8  ;;  %2564 = vpow2.f32 %v2206_v38  ;;  %v1329_v31 = vadd.f32 %v3214_v58, %v1285_v6 }
 0x247   : > { %v1251_v14 = vpop.f32.mrf.mxu0  ;;  %2566 = vrcp.f32 %v1447_v32 }
 0x248   : > { %v2553_v53 = vpop.eup %2552  ;;  %v3299_v29 = vadd.f32 %v3147_v61, %v1286_v41  ;;  %v1287_v12 = vadd.f32 %v1251_v14, %v945_v24  ;;  %v2208_v59 = vmul.f32 -1.442695, %v1329_v31 }
 0x249   : > { %v2555_v20 = vpop.eup %2554  ;;  %v1253_v60 = vpop.f32.mrf.mxu0  ;;  %v1531_v35 = vmul.f32 %v2553_v53, %v3071_v40 }
 0x24a   : > { %v1449_v3 = vadd.f32 1.0, %v2555_v20  ;;  %v1331_v8 = vadd.f32 %v3214_v58, %v1287_v12  ;;  %2568 = vpow2.f32 %v2208_v59  ;;  %v1288_v38 = vadd.f32 %v1253_v60, %v947_v1 }
 0x24b   : > { %v1255_v30 = vpop.f32.mrf.mxu0  ;;  %v1544_v6 = vpack.c.bf16 %v1531_v35, %v1530_v22  ;;  %v2557_v24 = vpop.eup %2556 }
 0x24c   : > { %2570 = vrcp.f32 %v1449_v3  ;;  %v2210_v28 = vmul.f32 -1.442695, %v1331_v8  ;;  %v1289_v41 = vadd.f32 %v1255_v30, %v949_v57  ;;  %v3305_v31 = vadd.f32 %v3147_v61, %v1288_v38  ;;  %v2559_v2 = vpop.eup %2558 }
 0x24d   : > { %2383 = vmatprep.mubr.bf16.mxu1 %v1544_v6  ;;  %v1451_v14 = vadd.f32 1.0, %v2557_v24  ;;  %v1532_v1 = vmul.f32 %v2559_v2, %v3080_v42 }
 0x24e   : > { %v1333_v40 = vadd.f32 %v3214_v58, %v1289_v41  ;;  %2572 = vpow2.f32 %v2210_v28 }
 0x24f   : > { %2574 = vrcp.f32 %v1451_v14 }
 0x250   : > { %v2561_v32 = vpop.eup %2560  ;;  %v2212_v53 = vmul.f32 -1.442695, %v1333_v40 }
 0x251   : > { %v2563_v12 = vpop.eup %2562  ;;  %v1533_v20 = vmul.f32 %v2561_v32, %v3085_v43 }
 0x252   : > { %v1453_v59 = vadd.f32 1.0, %v2563_v12  ;;  %2576 = vpow2.f32 %v2212_v53 }
 0x253   : > { %v1545_v60 = vpack.c.bf16 %v1533_v20, %v1532_v1  ;;  %v2565_v22 = vpop.eup %2564 }
 0x254   : > { %2578 = vrcp.f32 %v1453_v59  ;;  %v1455_v61 = vadd.f32 1.0, %v2565_v22  ;;  %v2567_v35 = vpop.eup %2566 }
 0x255   : > { %2384 = vmatmul.mubr.bf16.gmra.mxu1 %v1545_v60  ;;  %v1534_v57 = vmul.f32 %v2567_v35, %v3093_v45  ;;  %v2522_v35 = vld [vmem:[%s3509_s8 + $0x8] sm:$0xff]  }
 0x256   : > { %2580 = vrcp.f32 %v1455_v61  ;;  %v2521_v61 = vld [vmem:[%s3509_s8 + $0x10] sm:$0xff]  }
 0x257   : > { %v2569_v3 = vpop.eup %2568 }
 0x258   : > { %v1457_v58 = vadd.f32 1.0, %v2569_v3  ;;  %v2523_v3 = vld [vmem:[%s3509_s8] sm:$0xff]  }
 0x259   : > { %v2571_v8 = vpop.eup %2570 }
 0x25a   : > { %v1535_v38 = vmul.f32 %v2571_v8, %v3098_v46  ;;  %2582 = vrcp.f32 %v1457_v58  ;;  %v2181_v8 = vmul.f32 -1.442695, %v3219_v63  ;;  %v2185_v58 = vmul.f32 -1.442695, %v3231_v0 }
 0x25b   : > { %v2573_v30 = vpop.eup %2572  ;;  %v2195_v63 = vmul.f32 -1.442695, %v3260_v4 }
 0x25c   : > { %v1546_v43 = vpack.c.bf16 %v1535_v38, %v1534_v57  ;;  %v1459_v6 = vadd.f32 1.0, %v2573_v30  ;;  %v2575_v28 = vpop.eup %2574  ;;  %v2187_v57 = vmul.f32 -1.442695, %v3237_v5  ;;  %v2183_v38 = vmul.f32 -1.442695, %v3225_v50 }
 0x25d   : > { %v1536_v14 = vmul.f32 %v2575_v28, %v3106_v48  ;;  %v2189_v28 = vmul.f32 -1.442695, %v3243_v62  ;;  %v2191_v5 = vmul.f32 -1.442695, %v3249_v56 }
 0x25e   : > { %2387 = vmatprep.mubr.bf16.mxu1 %v1546_v43  ;;  %2584 = vrcp.f32 %v1459_v6  ;;  %v2193_v43 = vmul.f32 -1.442695, %v3254_v26  ;;  %v3353_v26 = vld [vmem:[%s3508_s7] ss:$0 sm:$0xff] }
 0x25f   : > { %v2577_v41 = vpop.eup %2576 }
 0x260   : > { %v1461_v2 = vadd.f32 1.0, %v2577_v41 }
 0x261   : > { %v2579_v24 = vpop.eup %2578 }
 0x262   : > { %v1537_v40 = vmul.f32 %v2579_v24, %v3111_v49  ;;  %2586 = vrcp.f32 %v1461_v2  ;;  %v2516_v49 = vld [vmem:[%s3509_s8 + $0x38] sm:$0xff]  }
 0x263   : > { %v2581_v53 = vpop.eup %2580  ;;  %2395 = vmatprep.subr.bf16.mxu1 %v2516_v49  ;;  %2588 = vpow2.f32 %v2181_v8 }
 0x264   : > { %v1547_v32 = vpack.c.bf16 %v1537_v40, %v1536_v14  ;;  %v1538_v46 = vmul.f32 %v2581_v53, %v3119_v51  ;;  %2396 = vmatpush3.bf16.msra.mxu1 %v2516_v49  ;;  %v2517_v51 = vld [vmem:[%s3509_s8 + $0x30] sm:$0xff]   ;;  %2590 = vpow2.f32 %v2185_v58 }
 0x265   : > { %2397 = vmatprep.subr.bf16.mxu1 %v2517_v51  ;;  %2592 = vpow2.f32 %v2187_v57 }
 0x266   : > { %2388 = vmatmul.mubr.bf16.gmra.mxu1 %v1547_v32  ;;  %2594 = vpow2.f32 %v2183_v38 }
 0x267   : > { %v2583_v45 = vpop.eup %2582  ;;  %2596 = vpow2.f32 %v2193_v43 }
 0x268   : > { %v1539_v12 = vmul.f32 %v2583_v45, %v3124_v52  ;;  %2398 = vmatpush3.bf16.msra.mxu1 %v2517_v51  ;;  %v2518_v52 = vld [vmem:[%s3509_s8 + $0x28] sm:$0xff]   ;;  %2598 = vpow2.f32 %v2189_v28  ;;  %v2203_v51 = vmul.f32 -1.442695, %v3285_v27 }
 0x269   : > { %2399 = vmatprep.subr.bf16.mxu1 %v2518_v52 }
 0x26a   : > { %v1548_v1 = vpack.c.bf16 %v1539_v12, %v1538_v46 }
 0x26b   : > { %v2585_v20 = vpop.eup %2584 }
 0x26c   : > { %2391 = vmatprep.mubr.bf16.mxu1 %v1548_v1  ;;  %v1540_v60 = vmul.f32 %v2585_v20, %v3132_v54  ;;  %2400 = vmatpush3.bf16.msra.mxu1 %v2518_v52  ;;  %v2519_v54 = vld [vmem:[%s3509_s8 + $0x20] sm:$0xff]  }
 0x26d   : > { %2401 = vmatprep.subr.bf16.mxu1 %v2519_v54 }
 0x26f   : > { %v2587_v59 = vpop.eup %2586 }
 0x270   : > { %v1541_v22 = vmul.f32 %v2587_v59, %v3137_v55  ;;  %2402 = vmatpush3.bf16.msra.mxu1 %v2519_v54  ;;  %v2520_v55 = vld [vmem:[%s3509_s8 + $0x18] sm:$0xff]   ;;  %v2589_v30 = vpop.eup %2588 }
 0x271   : > { %2403 = vmatprep.subr.bf16.mxu1 %v2520_v55  ;;  %v2591_v6 = vpop.eup %2590  ;;  %v1430_v41 = vadd.f32 1.0, %v2589_v30 }
 0x272   : > { %v1549_v48 = vpack.c.bf16 %v1541_v22, %v1540_v60  ;;  %v2593_v24 = vpop.eup %2592  ;;  %v1434_v0 = vadd.f32 1.0, %v2591_v6  ;;  %v2197_v22 = vmul.f32 -1.442695, %v3267_v10 }
 0x273   : > { %v2595_v2 = vpop.eup %2594  ;;  %2600 = vrcp.f32 %v1430_v41  ;;  %v1436_v50 = vadd.f32 1.0, %v2593_v24 }
 0x274   : > { %2392 = vmatmul.mubr.bf16.gmra.mxu1 %v1549_v48  ;;  %2602 = vpow2.f32 %v2195_v63  ;;  %v1432_v40 = vadd.f32 1.0, %v2595_v2  ;;  %v2597_v20 = vpop.eup %2596 }
 0x275   : > { %2404 = vmatpush3.bf16.msra.mxu1 %v2520_v55  ;;  %2604 = vrcp.f32 %v1434_v0  ;;  %v2599_v60 = vpop.eup %2598  ;;  %v1442_v49 = vadd.f32 1.0, %v2597_v20  ;;  %v2211_v20 = vmul.f32 -1.442695, %v3305_v31 }
 0x276   : > { %2405 = vmatprep.subr.bf16.mxu1 %v2521_v61  ;;  %2606 = vpow2.f32 %v2191_v5  ;;  %v1438_v54 = vadd.f32 1.0, %v2599_v60 }
 0x277   : > { %2608 = vrcp.f32 %v1436_v50 }
 0x279   : > { %2406 = vmatpush3.bf16.msra.mxu1 %v2521_v61 }
 0x27a   : > { %2407 = vmatprep.subr.bf16.mxu1 %v2522_v35 }
 0x27d   : > { %2408 = vmatpush3.bf16.msra.mxu1 %v2522_v35 }
 0x27e   : > { %2409 = vmatprep.subr.bf16.mxu1 %v2523_v3 }
 0x280   : > { %v2601_v48 = vpop.eup %2600 }
 0x281   : > { %2410 = vmatpush3.bf16.msra.mxu1 %v2523_v3  ;;  %v1782_v27 = vsub.f32 1.0, %v2601_v48  ;;  %v1766_v63 = vmul.f32 %v2601_v48, %v3038_v33 }
 0x304   : > { %v2381_v14 = vpop.f32.mrf.mxu1 }
 0x305   : > { %v1713_v62 = vadd.f32 %v2381_v14, %v3173_v7 }
 0x306   : > { %v1648_v4 = vpop.f32.mrf.mxu1 }
 0x307   : > { %v1736_v32 = vadd.f32 %v3353_v26, %v1713_v62  ;;  %v1711_v56 = vadd.f32 %v1648_v4, %v3175_v9  ;;  %v2201_v9 = vmul.f32 -1.442695, %v3278_v47 }
 0x308   : > { %v2382_v53 = vpop.f32.mrf.mxu1 }
 0x309   : > { %2610 = vtanh.f32 %v1736_v32  ;;  %v1734_v45 = vadd.f32 %v3353_v26, %v1711_v56  ;;  %v1714_v46 = vadd.f32 %v2382_v53, %v3177_v11  ;;  %v2603_v11 = vpop.eup %2602  ;;  %v2209_v32 = vmul.f32 -1.442695, %v3299_v29 }
 0x30a   : > { %2612 = vrcp.f32 %v1432_v40  ;;  %v1651_v12 = vpop.f32.mrf.mxu1  ;;  %v2605_v52 = vpop.eup %2604  ;;  %v1444_v61 = vadd.f32 1.0, %v2603_v11 }
 0x30b   : > { %2614 = vtanh.f32 %v1734_v45  ;;  %v1737_v1 = vadd.f32 %v3353_v26, %v1714_v46  ;;  %v1712_v7 = vadd.f32 %v1651_v12, %v3179_v13  ;;  %v2607_v55 = vpop.eup %2606  ;;  %v2199_v13 = vmul.f32 -1.442695, %v3272_v44 }
 0x30c   : > { %v2609_v47 = vpop.eup %2608  ;;  %v1784_v3 = vsub.f32 1.0, %v2605_v52  ;;  %v1440_v58 = vadd.f32 1.0, %v2607_v55  ;;  %v2205_v46 = vmul.f32 -1.442695, %v3289_v18 }
 0x30d   : > { %2616 = vtanh.f32 %v1737_v1  ;;  %v1735_v59 = vadd.f32 %v3353_v26, %v1712_v7  ;;  %v1785_v28 = vsub.f32 1.0, %v2609_v47  ;;  %v2207_v7 = vmul.f32 -1.442695, %v3295_v16 }
 0x30f   : > { %2618 = vtanh.f32 %v1735_v59 }
 0x310   : > { %2620 = vpow2.f32 %v2201_v9 }
 0x311   : > { %2622 = vpow2.f32 %v2197_v22 }
 0x312   : > { %2624 = vrcp.f32 %v1442_v49 }
 0x313   : > { %2626 = vpow2.f32 %v2203_v51 }
 0x314   : > { %2628 = vrcp.f32 %v1438_v54 }
 0x315   : > { %v2385_v35 = vpop.f32.mrf.mxu1  ;;  %2630 = vpow2.f32 %v2199_v13 }
 0x316   : > { %v1717_v10 = vadd.f32 %v2385_v35, %v3181_v15  ;;  %v2611_v8 = vpop.eup %2610  ;;  %2632 = vrcp.f32 %v1444_v61  ;;  %v1768_v15 = vmul.f32 %v2605_v52, %v3052_v36 }
 0x317   : > { %v1664_v57 = vpop.f32.mrf.mxu1  ;;  %v2613_v38 = vpop.eup %2612  ;;  %v1800_v30 = vmul.f32 %v2611_v8, %v1784_v3 }
 0x318   : > { %v1740_v43 = vadd.f32 %v3353_v26, %v1717_v10  ;;  %v1715_v44 = vadd.f32 %v1664_v57, %v3183_v17  ;;  %v2615_v6 = vpop.eup %2614  ;;  %v1783_v14 = vsub.f32 1.0, %v2613_v38  ;;  %v1769_v17 = vmul.f32 %v2609_v47, %v3057_v37 }
 0x319   : > { %v2386_v41 = vpop.f32.mrf.mxu1  ;;  %v1798_v5 = vmul.f32 %v2615_v6, %v1782_v27  ;;  %v1816_v62 = vadd.f32 %v1800_v30, %v1768_v15  ;;  %v1767_v56 = vmul.f32 %v2613_v38, %v3043_v34 }
 0x31a   : > { %2634 = vtanh.f32 %v1740_v43  ;;  %v1738_v24 = vadd.f32 %v3353_v26, %v1715_v44  ;;  %v1718_v0 = vadd.f32 %v2386_v41, %v3185_v19  ;;  %v2617_v2 = vpop.eup %2616 }
 0x31b   : > { %2636 = vrcp.f32 %v1440_v58  ;;  %v1667_v50 = vpop.f32.mrf.mxu1  ;;  %v1801_v40 = vmul.f32 %v2617_v2, %v1785_v28  ;;  %v1814_v19 = vadd.f32 %v1798_v5, %v1766_v63  ;;  %1832 = vst [vmem:[%s3512_s11 + $0x10] sm:$0xff] %v1816_v62  ;;  %v1848_v34 = vmax.f32 %v1816_v62, 0.0  ;;  %v3519_v63 = vld [vmem:[#allocation2_spill] sm:$0xff]  ;;  %v2685_v62 = vld [vmem:[%s3512_s11 + $0x28] sm:$0xff] }
 0x31c   : > { %2638 = vtanh.f32 %v1738_v24  ;;  %v1741_v4 = vadd.f32 %v3353_v26, %v1718_v0  ;;  %v1716_v33 = vadd.f32 %v1667_v50, %v3187_v21  ;;  %v2619_v36 = vpop.eup %2618 }
 0x31d   : > { %v1799_v53 = vmul.f32 %v2619_v36, %v1783_v14  ;;  %v1817_v45 = vadd.f32 %v1801_v40, %v1769_v17  ;;  %1830 = vst [vmem:[%s3512_s11] sm:$0xff] %v1814_v19  ;;  %v2621_v21 = vpop.eup %2620  ;;  %v1846_v18 = vmax.f32 %v1814_v19, 0.0  ;;  %v3520_v14 = vld [vmem:[#allocation3_spill] sm:$0xff] }
 0x31e   : > { %2640 = vtanh.f32 %v1741_v4  ;;  %v1739_v37 = vadd.f32 %v3353_v26, %v1716_v33  ;;  %v2623_v1 = vpop.eup %2622  ;;  %v1450_v48 = vadd.f32 1.0, %v2621_v21 }
 0x31f   : > { %v1815_v29 = vadd.f32 %v1799_v53, %v1767_v56  ;;  %1833 = vst [vmem:[%s3512_s11 + $0x18] sm:$0xff] %v1817_v45  ;;  %v1849_v12 = vmax.f32 %v1817_v45, 0.0  ;;  %v2625_v59 = vpop.eup %2624  ;;  %v1446_v52 = vadd.f32 1.0, %v2623_v1 }
 0x320   : > { %2642 = vtanh.f32 %v1739_v37  ;;  %v2627_v22 = vpop.eup %2626  ;;  %v1788_v55 = vsub.f32 1.0, %v2625_v59  ;;  %v1772_v8 = vmul.f32 %v2625_v59, %v3080_v42 }
 0x321   : > { %2644 = vpow2.f32 %v2209_v32  ;;  %1831 = vst [vmem:[%s3512_s11 + $0x8] sm:$0xff] %v1815_v29  ;;  %v1847_v9 = vmax.f32 %v1815_v29, 0.0  ;;  %v1863_v60 = vpack.c.bf16 %v1849_v12, %v1848_v34  ;;  %v2629_v49 = vpop.eup %2628  ;;  %v1452_v54 = vadd.f32 1.0, %v2627_v22 }
 0x322   : > { %2646 = vpow2.f32 %v2205_v46  ;;  %v2631_v51 = vpop.eup %2630  ;;  %v1786_v10 = vsub.f32 1.0, %v2629_v49  ;;  %v1770_v30 = vmul.f32 %v2629_v49, %v3066_v39 }
 0x323   : > { %v1862_v11 = vpack.c.bf16 %v1847_v9, %v1846_v18  ;;  %2648 = vpow2.f32 %v2211_v20  ;;  %v2633_v16 = vpop.eup %2632  ;;  %v1448_v47 = vadd.f32 1.0, %v2631_v51 }
 0x324   : > { %2650 = vpow2.f32 %v2207_v7 }
 0x325   : > { %2411 = vmatprep.mubr.bf16.mxu1 %v1862_v11  ;;  %2652 = vrcp.f32 %v1450_v48 }
 0x326   : > { %v2389_v31 = vpop.f32.mrf.mxu1  ;;  %2412 = vmatmul.mubr.bf16.vlgmr.msra.gmra.mxu1 %v1863_v60  ;;  %2654 = vrcp.f32 %v1446_v52  ;;  %v3521_v60 = vld [vmem:[#allocation4_spill] sm:$0xff] }
 0x327   : > { %v2635_v13 = vpop.eup %2634  ;;  %v1721_v61 = vadd.f32 %v2389_v31, %v3189_v23  ;;  %2656 = vrcp.f32 %v1452_v54  ;;  %v1789_v23 = vsub.f32 1.0, %v2633_v16  ;;  %v3522_v54 = vld [vmem:[#allocation5_spill] sm:$0xff] }
 0x328   : > { %v2637_v35 = vpop.eup %2636  ;;  %v1680_v3 = vpop.f32.mrf.mxu1  ;;  %v1804_v58 = vmul.f32 %v2635_v13, %v1788_v55 }
 0x329   : > { %v2639_v57 = vpop.eup %2638  ;;  %v1744_v27 = vadd.f32 %v3353_v26, %v1721_v61  ;;  %v1719_v38 = vadd.f32 %v1680_v3, %v3191_v25  ;;  %v1787_v15 = vsub.f32 1.0, %v2637_v35  ;;  %v2684_v25 = vld [vmem:[%s3512_s11 + $0x38] sm:$0xff]  ;;  %v1771_v40 = vmul.f32 %v2685_v62, %v2637_v35  ;;  %v2686_v35 = vld [vmem:[%s3512_s11 + $0x50] sm:$0xff] }
 0x32a   : > { %v2390_v43 = vpop.f32.mrf.mxu1  ;;  %v1802_v44 = vmul.f32 %v2639_v57, %v1786_v10  ;;  %v1820_v6 = vadd.f32 %v1804_v58, %v1772_v8  ;;  %v1773_v39 = vmul.f32 %v2684_v25, %v2633_v16  ;;  %v3523_v58 = vld [vmem:[#allocation6_spill] sm:$0xff] }
 0x32b   : > { %v2641_v28 = vpop.eup %2640  ;;  %2658 = vtanh.f32 %v1744_v27  ;;  %v1742_v41 = vadd.f32 %v3353_v26, %v1719_v38  ;;  %v1722_v42 = vadd.f32 %v2390_v43, %v3519_v63  ;;  %v2687_v27 = vld [vmem:[%s3512_s11 + $0x40] sm:$0xff] }
 0x32c   : > { %2660 = vrcp.f32 %v1448_v47  ;;  %v1683_v24 = vpop.f32.mrf.mxu1  ;;  %v1818_v0 = vadd.f32 %v1802_v44, %v1770_v30  ;;  %v1805_v5 = vmul.f32 %v2641_v28, %v1789_v23  ;;  %1836 = vst [vmem:[%s3512_s11 + $0x30] sm:$0xff] %v1820_v6  ;;  %v1852_v19 = vmax.f32 %v1820_v6, 0.0 }
 0x32d   : > { %v2643_v2 = vpop.eup %2642  ;;  %2662 = vtanh.f32 %v1742_v41  ;;  %v1745_v50 = vadd.f32 %v3353_v26, %v1722_v42  ;;  %v1720_v17 = vadd.f32 %v1683_v24, %v3520_v14  ;;  %v3524_v41 = vld [vmem:[#allocation7_spill] sm:$0xff]  ;;  %v2688_v24 = vld [vmem:[%s3512_s11 + $0x58] sm:$0xff] }
 0x32e   : > { %v1803_v4 = vmul.f32 %v2643_v2, %v1787_v15  ;;  %1834 = vst [vmem:[%s3512_s11 + $0x20] sm:$0xff] %v1818_v0  ;;  %v1821_v33 = vadd.f32 %v1805_v5, %v1773_v39  ;;  %v2645_v36 = vpop.eup %2644  ;;  %v1850_v21 = vmax.f32 %v1818_v0, 0.0  ;;  %v2689_v2 = vld [vmem:[%s3512_s11 + $0x48] sm:$0xff] }
 0x32f   : > { %2664 = vtanh.f32 %v1745_v50  ;;  %v1743_v32 = vadd.f32 %v3353_v26, %v1720_v17  ;;  %v2647_v53 = vpop.eup %2646  ;;  %v1458_v46 = vadd.f32 1.0, %v2645_v36 }
 0x330   : > { %v1819_v56 = vadd.f32 %v1803_v4, %v1771_v40  ;;  %1837 = vst [vmem:[%s3512_s11 + $0x38] sm:$0xff] %v1821_v33  ;;  %v1853_v37 = vmax.f32 %v1821_v33, 0.0  ;;  %v2649_v45 = vpop.eup %2648  ;;  %v1454_v7 = vadd.f32 1.0, %v2647_v53 }
 0x331   : > { %2666 = vtanh.f32 %v1743_v32  ;;  %v2651_v12 = vpop.eup %2650  ;;  %v1460_v59 = vadd.f32 1.0, %v2649_v45 }
 0x332   : > { %1835 = vst [vmem:[%s3512_s11 + $0x28] sm:$0xff] %v1819_v56  ;;  %v1851_v29 = vmax.f32 %v1819_v56, 0.0  ;;  %v1865_v34 = vpack.c.bf16 %v1853_v37, %v1852_v19  ;;  %v2653_v1 = vpop.eup %2652  ;;  %2668 = vrcp.f32 %v1458_v46  ;;  %v1456_v49 = vadd.f32 1.0, %v2651_v12 }
 0x333   : > { %v2655_v9 = vpop.eup %2654  ;;  %v1792_v51 = vsub.f32 1.0, %v2653_v1  ;;  %2670 = vrcp.f32 %v1454_v7  ;;  %v1776_v47 = vmul.f32 %v2686_v35, %v2653_v1  ;;  %v2691_v7 = vld [vmem:[%s3512_s11 + $0x60] sm:$0xff] }
 0x334   : > { %v1864_v20 = vpack.c.bf16 %v1851_v29, %v1850_v21  ;;  %v2393_v18 = vpop.f32.mrf.mxu1  ;;  %v2657_v48 = vpop.eup %2656  ;;  %2672 = vrcp.f32 %v1460_v59  ;;  %v1790_v61 = vsub.f32 1.0, %v2655_v9  ;;  %v1774_v38 = vmul.f32 %v2687_v27, %v2655_v9  ;;  %v2690_v29 = vld [vmem:[%s3512_s11 + $0x70] sm:$0xff] }
 0x335   : > { %v1725_v22 = vadd.f32 %v2393_v18, %v3521_v60  ;;  %v1793_v44 = vsub.f32 1.0, %v2657_v48  ;;  %v1777_v0 = vmul.f32 %v2688_v24, %v2657_v48 }
 0x336   : > { %2415 = vmatprep.mubr.bf16.mxu1 %v1864_v20  ;;  %v1696_v11 = vpop.f32.mrf.mxu1 }
 0x337   : > { %2416 = vmatmul.mubr.bf16.gmra.mxu1 %v1865_v34  ;;  %v1748_v16 = vadd.f32 %v3353_v26, %v1725_v22  ;;  %v1723_v31 = vadd.f32 %v1696_v11, %v3522_v54 }
 0x338   : > { %v2659_v52 = vpop.eup %2658  ;;  %v2394_v13 = vpop.f32.mrf.mxu1 }
 0x339   : > { %v2661_v55 = vpop.eup %2660  ;;  %v1808_v3 = vmul.f32 %v2659_v52, %v1792_v51  ;;  %2674 = vtanh.f32 %v1748_v16  ;;  %v1746_v8 = vadd.f32 %v3353_v26, %v1723_v31  ;;  %v1726_v57 = vadd.f32 %v2394_v13, %v3523_v58  ;;  %v2693_v16 = vld [vmem:[%s3512_s11 + $0x68] sm:$0xff]  ;;  %v2222_v58 = vld [vmem:[%s3510_s9] ss:$0 sm:$0xff] }
 0x33a   : > { %v2663_v10 = vpop.eup %2662  ;;  %2676 = vrcp.f32 %v1456_v49  ;;  %v1699_v30 = vpop.f32.mrf.mxu1  ;;  %v1791_v42 = vsub.f32 1.0, %v2661_v55  ;;  %v1775_v50 = vmul.f32 %v2689_v2, %v2661_v55  ;;  %v2692_v49 = vld [vmem:[%s3512_s11 + $0x78] sm:$0xff] }
 0x33b   : > { %v1806_v43 = vmul.f32 %v2663_v10, %v1790_v61  ;;  %v1824_v23 = vadd.f32 %v1808_v3, %v1776_v47  ;;  %2678 = vtanh.f32 %v1746_v8  ;;  %v1749_v28 = vadd.f32 %v3353_v26, %v1726_v57 }
 0x33c   : > { %v2665_v6 = vpop.eup %2664  ;;  %v1724_v63 = vadd.f32 %v1699_v30, %v3524_v41 }
 0x33d   : > { %v1822_v15 = vadd.f32 %v1806_v43, %v1774_v38  ;;  %v1809_v25 = vmul.f32 %v2665_v6, %v1793_v44  ;;  %1840 = vst [vmem:[%s3512_s11 + $0x50] sm:$0xff] %v1824_v23  ;;  %2680 = vtanh.f32 %v1749_v28  ;;  %v1856_v40 = vmax.f32 %v1824_v23, 0.0 }
 0x33e   : > { %v2667_v39 = vpop.eup %2666  ;;  %v1747_v5 = vadd.f32 %v3353_v26, %v1724_v63 }
 0x33f   : > { %v1807_v14 = vmul.f32 %v2667_v39, %v1791_v42  ;;  %1838 = vst [vmem:[%s3512_s11 + $0x40] sm:$0xff] %v1822_v15  ;;  %v1825_v17 = vadd.f32 %v1809_v25, %v1777_v0  ;;  %v2669_v26 = vpop.eup %2668  ;;  %v1854_v33 = vmax.f32 %v1822_v15, 0.0 }
 0x340   : > { %2682 = vtanh.f32 %v1747_v5  ;;  %v2671_v56 = vpop.eup %2670  ;;  %v1796_v53 = vsub.f32 1.0, %v2669_v26  ;;  %v1780_v34 = vmul.f32 %v2690_v29, %v2669_v26 }
 0x341   : > { %v1823_v62 = vadd.f32 %v1807_v14, %v1775_v50  ;;  %1841 = vst [vmem:[%s3512_s11 + $0x58] sm:$0xff] %v1825_v17  ;;  %v1857_v4 = vmax.f32 %v1825_v17, 0.0  ;;  %v2673_v37 = vpop.eup %2672  ;;  %v1794_v21 = vsub.f32 1.0, %v2671_v56  ;;  %v1778_v20 = vmul.f32 %v2691_v7, %v2671_v56 }
 0x342   : > { %v1797_v18 = vsub.f32 1.0, %v2673_v37  ;;  %v1781_v11 = vmul.f32 %v2692_v49, %v2673_v37 }
 0x343   : > { %1839 = vst [vmem:[%s3512_s11 + $0x48] sm:$0xff] %v1823_v62  ;;  %v1855_v36 = vmax.f32 %v1823_v62, 0.0  ;;  %v1867_v32 = vpack.c.bf16 %v1857_v4, %v1856_v40 }
 0x345   : > { %v1866_v19 = vpack.c.bf16 %v1855_v36, %v1854_v33 }
 0x346   : > { %v2675_v45 = vpop.eup %2674 }
 0x347   : > { %2419 = vmatprep.mubr.bf16.mxu1 %v1866_v19  ;;  %v2677_v46 = vpop.eup %2676  ;;  %v1812_v12 = vmul.f32 %v2675_v45, %v1796_v53 }
 0x348   : > { %2420 = vmatmul.mubr.bf16.gmra.mxu1 %v1867_v32  ;;  %v2679_v1 = vpop.eup %2678  ;;  %v1795_v22 = vsub.f32 1.0, %v2677_v46  ;;  %v1779_v54 = vmul.f32 %v2693_v16, %v2677_v46 }
 0x349   : > { %v1810_v59 = vmul.f32 %v2679_v1, %v1794_v21  ;;  %v1828_v9 = vadd.f32 %v1812_v12, %v1780_v34 }
 0x34a   : > { %v2681_v60 = vpop.eup %2680 }
 0x34b   : > { %v1826_v48 = vadd.f32 %v1810_v59, %v1778_v20  ;;  %v1813_v51 = vmul.f32 %v2681_v60, %v1797_v18  ;;  %1844 = vst [vmem:[%s3512_s11 + $0x70] sm:$0xff] %v1828_v9  ;;  %v1860_v61 = vmax.f32 %v1828_v9, 0.0 }
 0x34d   : > { %v2683_v52 = vpop.eup %2682  ;;  %1842 = vst [vmem:[%s3512_s11 + $0x60] sm:$0xff] %v1826_v48  ;;  %v1829_v55 = vadd.f32 %v1813_v51, %v1781_v11  ;;  %v1858_v47 = vmax.f32 %v1826_v48, 0.0 }
 0x34e   : > { %v1811_v31 = vmul.f32 %v2683_v52, %v1795_v22 }
 0x34f   : > { %1845 = vst [vmem:[%s3512_s11 + $0x78] sm:$0xff] %v1829_v55  ;;  %v1861_v35 = vmax.f32 %v1829_v55, 0.0 }
 0x350   : > { %v1827_v13 = vadd.f32 %v1811_v31, %v1779_v54 }
 0x351   : > { %v1869_v10 = vpack.c.bf16 %v1861_v35, %v1860_v61 }
 0x352   : > { %1843 = vst [vmem:[%s3512_s11 + $0x68] sm:$0xff] %v1827_v13  ;;  %v1859_v3 = vmax.f32 %v1827_v13, 0.0 }
 0x354   : > { %v1868_v8 = vpack.c.bf16 %v1859_v3, %v1858_v47 }
 0x356   : > { %2423 = vmatprep.mubr.bf16.mxu1 %v1868_v8 }
 0x357   : > { %2424 = vmatmul.mubr.bf16.gmra.mxu1 %v1869_v10 }
 0x3e6   : > { %v2413_v57 = vpop.f32.mrf.mxu1 }
 0x3e7   : > { %v1984_v27 = vadd.f32 %v2413_v57, %v2222_v58 }
 0x3e8   : > { %v1975_v38 = vpop.f32.mrf.mxu1 }
 0x3e9   : > { %2040 = vst [vmem:[%s2779_s27 + $0x10] sm:$0xff] %v1984_v27  ;;  %v1976_v30 = vadd.f32 %v2222_v58, %v1975_v38 }
 0x3ea   : > { %v2414_v43 = vpop.f32.mrf.mxu1 }
 0x3eb   : > { %2038 = vst [vmem:[%s2779_s27] sm:$0xff] %v1976_v30  ;;  %v1987_v44 = vadd.f32 %v2414_v43, %v2222_v58 }
 0x3ec   : > { %v1978_v23 = vpop.f32.mrf.mxu1 }
 0x3ed   : > { %2041 = vst [vmem:[%s2779_s27 + $0x18] sm:$0xff] %v1987_v44  ;;  %v1979_v6 = vadd.f32 %v2222_v58, %v1978_v23 }
 0x3ef   : > { %2039 = vst [vmem:[%s2779_s27 + $0x8] sm:$0xff] %v1979_v6 }
 0x3f7   : > { %v2417_v28 = vpop.f32.mrf.mxu1 }
 0x3f8   : > { %v2000_v41 = vadd.f32 %v2417_v28, %v2222_v58 }
 0x3f9   : > { %v1991_v63 = vpop.f32.mrf.mxu1 }
 0x3fa   : > { %2044 = vst [vmem:[%s2779_s27 + $0x30] sm:$0xff] %v2000_v41  ;;  %v1992_v42 = vadd.f32 %v2222_v58, %v1991_v63 }
 0x3fb   : > { %v2418_v15 = vpop.f32.mrf.mxu1 }
 0x3fc   : > { %2042 = vst [vmem:[%s2779_s27 + $0x20] sm:$0xff] %v1992_v42  ;;  %v2003_v24 = vadd.f32 %v2418_v15, %v2222_v58 }
 0x3fd   : > { %v1994_v0 = vpop.f32.mrf.mxu1 }
 0x3fe   : > { %2045 = vst [vmem:[%s2779_s27 + $0x38] sm:$0xff] %v2003_v24  ;;  %v1995_v25 = vadd.f32 %v2222_v58, %v1994_v0 }
 0x400   : > { %2043 = vst [vmem:[%s2779_s27 + $0x28] sm:$0xff] %v1995_v25 }
 0x408   : > { %v2421_v39 = vpop.f32.mrf.mxu1 }
 0x409   : > { %v2016_v5 = vadd.f32 %v2421_v39, %v2222_v58 }
 0x40a   : > { %v2007_v2 = vpop.f32.mrf.mxu1 }
 0x40b   : > { %2048 = vst [vmem:[%s2779_s27 + $0x50] sm:$0xff] %v2016_v5  ;;  %v2008_v50 = vadd.f32 %v2222_v58, %v2007_v2 }
 0x40c   : > { %v2422_v14 = vpop.f32.mrf.mxu1 }
 0x40d   : > { %2046 = vst [vmem:[%s2779_s27 + $0x40] sm:$0xff] %v2008_v50  ;;  %v2019_v17 = vadd.f32 %v2422_v14, %v2222_v58 }
 0x40e   : > { %v2010_v62 = vpop.f32.mrf.mxu1 }
 0x40f   : > { %2049 = vst [vmem:[%s2779_s27 + $0x58] sm:$0xff] %v2019_v17  ;;  %v2011_v40 = vadd.f32 %v2222_v58, %v2010_v62 }
 0x411   : > { %2047 = vst [vmem:[%s2779_s27 + $0x48] sm:$0xff] %v2011_v40 }
 0x417   : > { %v2425_v4 = vpop.f32.mrf.mxu1 }
 0x418   : > { %v2032_v26 = vadd.f32 %v2425_v4, %v2222_v58 }
 0x419   : > { %v2023_v33 = vpop.f32.mrf.mxu1 }
 0x41a   : > { %2052 = vst [vmem:[%s2779_s27 + $0x70] sm:$0xff] %v2032_v26  ;;  %v2024_v36 = vadd.f32 %v2222_v58, %v2023_v33 }
 0x41b   : > { %v2426_v32 = vpop.f32.mrf.mxu1 }
 0x41c   : > { %2050 = vst [vmem:[%s2779_s27 + $0x60] sm:$0xff] %v2024_v36  ;;  %v2035_v56 = vadd.f32 %v2426_v32, %v2222_v58 }
 0x41d   : > { %v2026_v19 = vpop.f32.mrf.mxu1 }
 0x41e   : > { %2053 = vst [vmem:[%s2779_s27 + $0x78] sm:$0xff] %v2035_v56  ;;  %v2027_v37 = vadd.f32 %v2222_v58, %v2026_v19 }
 0x420   : > { %2051 = vst [vmem:[%s2779_s27 + $0x68] sm:$0xff] %v2027_v37 }
 0x421 PF: > { %s22_s17 = sadd.s32 1, %s2700_s17  }
 0x422   : > { %p19_p5 = scmp.ge.s32.totalorder %s22_s17, 10  }
 0x424   :  { %21 = sbr.rel (!%p19_p5) target bundleno = 1 (0x1), region = 102 }

</bundles_post_ra>
